<compile_context>
chip_gen: v6e
topology: v6e:2x2x1
jax: 0.10.0
libtpu: 0.0.40
codegen_flags: <defaults>
</compile_context>

<pallas_src>
import functools

import jax
import jax.numpy as jnp
from jax.experimental import pallas as pl
from jax.experimental.pallas import tpu as pltpu

HIDDEN = 768
NUM_CLASSES = 6
NUM_CLASSES_PAD = 128   # full lane width; halves padded-output/weight traffic vs 256


def _round_up(a: int, b: int) -> int:
    return ((a + b - 1) // b) * b


def _use_bf16_activations() -> bool:
    """bf16 bias+tanh path only on chips with a bf16 VPU/EUP (v6e/v7x)."""
    try:
        kind = jax.devices()[0].device_kind.lower()
        return "v5" not in kind
    except Exception:
        return False


def head_kernel(x_ref, w1_ref, b1_ref, w2_ref, b2_ref, o_ref, *, bf16_act: bool):
    # Dropout(p=0.5) is the identity in eval/inference mode.
    # TODO(synk): training-mode dropout (stochastic masking) not implemented.
    x = x_ref[...].astype(jnp.bfloat16)                             # cast in-kernel (no extra HBM pass)
    h = jnp.dot(x, w1_ref[...], preferred_element_type=jnp.float32)  # dense matmul, f32 acc
    if bf16_act:
        # v6e/v7x: bf16 VPU/EUP -> do bias+tanh packed, feeds MXU directly.
        h = jnp.tanh((h + b1_ref[...]).astype(jnp.bfloat16))
    else:
        # v5e: no bf16 VPU/EUP -> keep elementwise in f32, single cast after.
        h = jnp.tanh(h + b1_ref[...]).astype(jnp.bfloat16)
    o = jnp.dot(h, w2_ref[...], preferred_element_type=jnp.float32)  # out_proj, f32 acc
    o_ref[...] = (o + b2_ref[...]).astype(o_ref.dtype)


def roberta_classification_head(x, w1, b1, w2p, b2p, *, tm=512):
    """Fused RoBERTa classification head.

    x   : [B, 768]    float (kept in native dtype; cast to bf16 inside kernel)
    w1  : [768, 768]  dense weight, [in, out] layout, bf16
    b1  : [1, 768]    dense bias, f32
    w2p : [768, 128]  out_proj weight, zero-padded to 128 cols, bf16
    b2p : [1, 128]    out_proj bias, zero-padded, f32
    returns [B, 6] f32 logits.
    """
    B, H = x.shape
    Npad = w2p.shape[1]
    assert H == HIDDEN

    # Batch tile: single grid step for small batches (round to 16 rows for
    # clean packed layouts); tm-sized tiles for large batches.
    b16 = _round_up(B, 16)
    tm_eff = b16 if b16 <= tm else tm
    bp = _round_up(b16, tm_eff)

    if bp != B:
        x = jnp.pad(x, ((0, bp - B), (0, 0)))   # single pad, native dtype

    kernel = functools.partial(head_kernel, bf16_act=_use_bf16_activations())

    out_padded = pl.pallas_call(
        kernel,
        out_shape=jax.ShapeDtypeStruct((bp, Npad), jnp.float32),
        grid_spec=pltpu.PrefetchScalarGridSpec(
            num_scalar_prefetch=0,
            grid=(bp // tm_eff,),
            in_specs=[
                pl.BlockSpec((tm_eff, H), lambda i: (i, 0)),    # x tile (native dtype)
                # Constant index_map => DMA'd once, resident across the grid.
                pl.BlockSpec((H, H), lambda i: (0, 0)),         # dense weight (bf16)
                pl.BlockSpec((1, H), lambda i: (0, 0)),         # dense bias (f32)
                pl.BlockSpec((H, Npad), lambda i: (0, 0)),      # out_proj weight (bf16)
                pl.BlockSpec((1, Npad), lambda i: (0, 0)),      # out_proj bias (f32)
            ],
            out_specs=pl.BlockSpec((tm_eff, Npad), lambda i: (i, 0)),
        ),
        compiler_params=pltpu.CompilerParams(
            dimension_semantics=("parallel",),
            vmem_limit_bytes=32 * 1024 * 1024,
        ),
    )(x, w1, b1, w2p, b2p)

    return out_padded[:B, :NUM_CLASSES]


def init_params(key):
    k1, k2, k3, k4 = jax.random.split(key, 4)
    # Deterministic synthetic init (not a checkpoint); [in, out] layout.
    w1 = jax.random.normal(k1, (HIDDEN, HIDDEN), jnp.float32) * 0.02
    b1 = jax.random.normal(k2, (1, HIDDEN), jnp.float32) * 0.02
    w2 = jax.random.normal(k3, (HIDDEN, NUM_CLASSES), jnp.float32) * 0.02
    b2 = jax.random.normal(k4, (1, NUM_CLASSES), jnp.float32) * 0.02

    # Kernel-side params: bf16 matmul operands, zero-padded lane-dense out_proj.
    w1_k = w1.astype(jnp.bfloat16)
    w2p = (jnp.zeros((HIDDEN, NUM_CLASSES_PAD), jnp.float32)
           .at[:, :NUM_CLASSES].set(w2)).astype(jnp.bfloat16)
    b2p = jnp.zeros((1, NUM_CLASSES_PAD), jnp.float32).at[:, :NUM_CLASSES].set(b2)
    return (w1, b1, w2, b2), (w1_k, b1, w2p, b2p)


if __name__ == "__main__":
    key = jax.random.PRNGKey(0)
    kx, kp = jax.random.split(key)

    B = 8
    x = jax.random.normal(kx, (B, HIDDEN), jnp.float32)
    (w1, b1, w2, b2), (w1_k, b1_k, w2p, b2p) = init_params(kp)

    out = roberta_classification_head(x, w1_k, b1_k, w2p, b2p)
    out = jax.block_until_ready(out)

    # Pure-JAX f32 reference; loose tolerance covers bf16 matmul operands and
    # the bf16 bias/tanh path on v6e/v7x (MXU accumulation stays f32).
    ref = jnp.tanh(x @ w1 + b1) @ w2 + b2
    assert out.shape == (B, NUM_CLASSES)
    assert jnp.allclose(out, ref, atol=5e-2, rtol=5e-2), "mismatch vs reference"

    print("KERNEL_OK")
</pallas_src>

<mosaic_0001>
module attributes {stable_mosaic.version = 11 : i64} {
  func.func @head_kernel(%arg0: i32, %arg1: memref<16x768xf32, #tpu.memory_space<vmem>>, %arg2: memref<768x768xbf16, #tpu.memory_space<vmem>>, %arg3: memref<1x768xf32, #tpu.memory_space<vmem>>, %arg4: memref<768x128xbf16, #tpu.memory_space<vmem>>, %arg5: memref<1x128xf32, #tpu.memory_space<vmem>>, %arg6: memref<16x128xf32, #tpu.memory_space<vmem>>) attributes {dimension_semantics = [#tpu.dimension_semantics<parallel>], iteration_bounds = array<i64: 1>, scalar_prefetch = 0 : i64, scratch_operands = 0 : i64, tpu.core_type = #tpu.core_type<tc>, window_params = [{transform_indices = @transform_0, window_bounds = array<i64: 16, 768>}, {pipeline_mode = #tpu.pipeline_mode<synchronous>, transform_indices = @transform_1, window_bounds = array<i64: 768, 768>}, {pipeline_mode = #tpu.pipeline_mode<synchronous>, transform_indices = @transform_2, window_bounds = array<i64: 1, 768>}, {pipeline_mode = #tpu.pipeline_mode<synchronous>, transform_indices = @transform_3, window_bounds = array<i64: 768, 128>}, {pipeline_mode = #tpu.pipeline_mode<synchronous>, transform_indices = @transform_4, window_bounds = array<i64: 1, 128>}, {transform_indices = @transform_5, window_bounds = array<i64: 16, 128>}]} {
    %c0 = arith.constant 0 : index
    %c0_0 = arith.constant 0 : index
    %0 = vector.load %arg1[%c0, %c0_0] : memref<16x768xf32, #tpu.memory_space<vmem>>, vector<16x768xf32>
    %1 = arith.truncf %0 : vector<16x768xf32> to vector<16x768xbf16>
    %c0_1 = arith.constant 0 : index
    %c0_2 = arith.constant 0 : index
    %2 = vector.load %arg2[%c0_1, %c0_2] : memref<768x768xbf16, #tpu.memory_space<vmem>>, vector<768x768xbf16>
    %cst = arith.constant dense<0.000000e+00> : vector<16x768xf32>
    %3 = tpu.matmul %1, %2, %cst {dimension_numbers = #tpu.dot_dimension_numbers<[1], [0], [0], [1], [0, 0, 1, 1], [], []>} : vector<16x768xbf16>, vector<768x768xbf16>, vector<16x768xf32> -> vector<16x768xf32>
    %c0_3 = arith.constant 0 : index
    %c0_4 = arith.constant 0 : index
    %4 = vector.load %arg3[%c0_3, %c0_4] : memref<1x768xf32, #tpu.memory_space<vmem>>, vector<1x768xf32>
    %5 = vector.broadcast %4 : vector<1x768xf32> to vector<16x768xf32>
    %6 = arith.addf %3, %5 : vector<16x768xf32>
    %7 = arith.truncf %6 : vector<16x768xf32> to vector<16x768xbf16>
    %8 = math.tanh %7 : vector<16x768xbf16>
    %c0_5 = arith.constant 0 : index
    %c0_6 = arith.constant 0 : index
    %9 = vector.load %arg4[%c0_5, %c0_6] : memref<768x128xbf16, #tpu.memory_space<vmem>>, vector<768x128xbf16>
    %cst_7 = arith.constant dense<0.000000e+00> : vector<16x128xf32>
    %10 = tpu.matmul %8, %9, %cst_7 {dimension_numbers = #tpu.dot_dimension_numbers<[1], [0], [0], [1], [0, 0, 1, 1], [], []>} : vector<16x768xbf16>, vector<768x128xbf16>, vector<16x128xf32> -> vector<16x128xf32>
    %c0_8 = arith.constant 0 : index
    %c0_9 = arith.constant 0 : index
    %11 = vector.load %arg5[%c0_8, %c0_9] : memref<1x128xf32, #tpu.memory_space<vmem>>, vector<1x128xf32>
    %12 = vector.broadcast %11 : vector<1x128xf32> to vector<16x128xf32>
    %13 = arith.addf %10, %12 : vector<16x128xf32>
    %c0_10 = arith.constant 0 : index
    %c0_11 = arith.constant 0 : index
    %14 = vector.load %arg6[%c0_10, %c0_11] : memref<16x128xf32, #tpu.memory_space<vmem>>, vector<16x128xf32>
    tpu.vector_store %arg6[%c0_10, %c0_11], %13 {strides = array<i32>} : memref<16x128xf32, #tpu.memory_space<vmem>>, vector<16x128xf32>,
    return
  }
  func.func @transform_0(%arg0: i32) -> (i32, i32) {
    %c0_i32 = arith.constant 0 : i32
    %c0_i32_0 = arith.constant 0 : i32
    return %arg0, %c0_i32 : i32, i32
  }
  func.func @transform_1(%arg0: i32) -> (i32, i32) {
    %c0_i32 = arith.constant 0 : i32
    %c0_i32_0 = arith.constant 0 : i32
    %c0_i32_1 = arith.constant 0 : i32
    return %c0_i32, %c0_i32_0 : i32, i32
  }
  func.func @transform_2(%arg0: i32) -> (i32, i32) {
    %c0_i32 = arith.constant 0 : i32
    %c0_i32_0 = arith.constant 0 : i32
    %c0_i32_1 = arith.constant 0 : i32
    return %c0_i32, %c0_i32_0 : i32, i32
  }
  func.func @transform_3(%arg0: i32) -> (i32, i32) {
    %c0_i32 = arith.constant 0 : i32
    %c0_i32_0 = arith.constant 0 : i32
    %c0_i32_1 = arith.constant 0 : i32
    return %c0_i32, %c0_i32_0 : i32, i32
  }
  func.func @transform_4(%arg0: i32) -> (i32, i32) {
    %c0_i32 = arith.constant 0 : i32
    %c0_i32_0 = arith.constant 0 : i32
    %c0_i32_1 = arith.constant 0 : i32
    return %c0_i32, %c0_i32_0 : i32, i32
  }
  func.func @transform_5(%arg0: i32) -> (i32, i32) {
    %c0_i32 = arith.constant 0 : i32
    %c0_i32_0 = arith.constant 0 : i32
    return %arg0, %c0_i32 : i32, i32
  }
}

</mosaic_0001>

<bundles_post_ra>
// kernel: tpu_custom_call.1
= control target key start
LH: loop header
LB: loop body
LE: loop exit
PB: predicated region body
PF: predicated region fallthrough
CT: control target
= control target key end

     0   :  { %10 = vsyncpa [#allocation3], 0  ;;  %s3943_s0 = inlined_call_operand.hbm [shape: f32[16,768], index: 0, kind: input, shape index: {}]   ;;  %s3944_s1 = inlined_call_operand.hbm [shape: bf16[768,768], index: 1, kind: input, shape index: {}]   ;;  %s3945_s2 = inlined_call_operand.hbm [shape: f32[1,768], index: 2, kind: input, shape index: {}]   ;;  %s3946_s3 = inlined_call_operand.hbm [shape: bf16[768,128], index: 3, kind: input, shape index: {}]   ;;  %s3947_s4 = inlined_call_operand.hbm [shape: f32[1,128], index: 4, kind: input, shape index: {}]   ;;  %s3948_s5 = inlined_call_operand.hbm [shape: f32[16,128], index: 5, kind: output, shape index: {}]  }
   0x1   :  { %11 = vsyncpa [#allocation6], 0 }
   0x2   :  { %12 = vsyncpa [#allocation9], 0 }
   0x3   :  { %13 = vsyncpa [#allocation4], 0  ;;  %s3835_s18 = smov [#allocation5]  }
   0x4   :  { %s31_s19 = sshll.u32 %s3835_s18, 4  ;;  %s32_s19 = int_to_ptr.vmem [resolvable:$true] %s31_s19 }
   0x5   :  { %s3715_s20 = scalar_lea.vmem %s32_s19, 36864  ;;  %p3720_p1 = scmp.lt.s32.totalorder %s32_s19, %s32_s19 }
   0x6   :  { %p3716_p0 = scmp.ne.s32.totalorder %s32_s19, %s3715_s20  ;;  %p3721_p2 = scmp.lt.s32.totalorder %s3715_s20, %s3715_s20 }
   0x8   :  { %p3722_p3 = por %p3721_p2, %p3720_p1 }
   0xa   :  { %p3723_p4 = pnand %p3722_p3, %p3716_p0 }
   0xc   :  { %3726 = shalt.err (!%p3723_p4)
}
   0xd   :  { %s3836_s21 = smov 384   ;;  %s3837_s22 = smov 24  }
   0xe   :  { %37 = dma.hbm_to_vmem [thread:$0]  %s3944_s1, 36864, %s32_s19, [#allocation6], %s3836_s21, %s3836_s21, %s3837_s22  }
   0xf   :  { %s3838_s25 = smov [#allocation8]  }
  0x10   :  { %s53_s26 = sshll.u32 %s3838_s25, 4  ;;  %s54_s26 = int_to_ptr.vmem [resolvable:$true] %s53_s26 }
  0x11   :  { %s3735_s27 = scalar_lea.vmem %s54_s26, 6144  ;;  %p3740_p6 = scmp.lt.s32.totalorder %s54_s26, %s54_s26 }
  0x12   :  { %p3736_p5 = scmp.ne.s32.totalorder %s54_s26, %s3735_s27  ;;  %p3741_p7 = scmp.lt.s32.totalorder %s3735_s27, %s3735_s27 }
  0x14   :  { %p3742_p8 = por %p3741_p7, %p3740_p6 }
  0x16   :  { %p3743_p9 = pnand %p3742_p8, %p3736_p5 }
  0x18   :  { %3746 = shalt.err (!%p3743_p9)
}
  0x19   :  { %s3839_s28 = smov 64   ;;  %s3840_s29 = smov 4  }
  0x1a   :  { %59 = dma.hbm_to_vmem [thread:$0]  %s3946_s3, 6144, %s54_s26, [#allocation9], %s3839_s28, %s3839_s28, %s3840_s29  }
  0x1b   :  { %s3841_s7 = smov [#allocation2]  }
  0x1c   :  { %s19_s8 = sshll.u32 %s3841_s7, 4  ;;  %s20_s8 = int_to_ptr.vmem [resolvable:$true] %s19_s8 }
  0x1d   :  { %s3755_s1 = scalar_lea.vmem %s20_s8, 1536  ;;  %p3760_p11 = scmp.lt.s32.totalorder %s20_s8, %s20_s8 }
  0x1e   :  { %p3756_p10 = scmp.ne.s32.totalorder %s20_s8, %s3755_s1  ;;  %p3761_p12 = scmp.lt.s32.totalorder %s3755_s1, %s3755_s1 }
  0x20   :  { %p3762_p13 = por %p3761_p12, %p3760_p11 }
  0x22   :  { %p3763_p0 = pnand %p3762_p13, %p3756_p10 }
  0x24   :  { %3766 = shalt.err (!%p3763_p0)
}
  0x25   :  { %s3842_s9 = smov 768   ;;  %s3843_s10 = smov 48  }
  0x26   :  { %25 = dma.hbm_to_vmem [thread:$0]  %s3943_s0, 1536, %s20_s8, [#allocation3], %s3842_s9, %s3842_s9, %s3843_s10  }
  0x27   :  { %s3844_s13 = smov [#allocation7]   ;;  %s3845_s3 = smov [#allocation10]  }
  0x28   :  { %s44_s14 = sshll.u32 %s3844_s13, 4  ;;  %s66_s15 = sshll.u32 %s3845_s3, 4  ;;  %s45_s14 = int_to_ptr.vmem [resolvable:$true] %s44_s14  ;;  %s67_s15 = int_to_ptr.vmem [resolvable:$true] %s66_s15 }
  0x29   :  { %s3775_s16 = scalar_lea.vmem %s45_s14, 96  ;;  %p3780_p2 = scmp.lt.s32.totalorder %s45_s14, %s45_s14 }
  0x2a   :  { %p3776_p1 = scmp.ne.s32.totalorder %s45_s14, %s3775_s16  ;;  %p3781_p3 = scmp.lt.s32.totalorder %s3775_s16, %s3775_s16 }
  0x2c   :  { %p3782_p4 = por %p3781_p3, %p3780_p2 }
  0x2e   :  { %p3783_p5 = pnand %p3782_p4, %p3776_p1 }
  0x30   :  { %3786 = shalt.err (!%p3783_p5)
}
  0x31   :  { %47 = dma.hbm_to_vmem [thread:$0]  %s3945_s2, 96, %s45_s14, [#allocation6]  }
  0x32   :  { %s3795_s19 = scalar_lea.vmem %s67_s15, 16  ;;  %s3799_s0 = scalar_lea.vmem %s67_s15, 32 }
  0x33   :  { %p3796_p6 = scmp.ne.s32.totalorder %s67_s15, %s3795_s19  ;;  %p3800_p7 = scmp.lt.s32.totalorder %s67_s15, %s67_s15 }
  0x34   :  { %p3801_p8 = scmp.lt.s32.totalorder %s3799_s0, %s3795_s19 }
  0x36   :  { %p3802_p9 = por %p3801_p8, %p3800_p7 }
  0x38   :  { %p3803_p10 = pnand %p3802_p9, %p3796_p6 }
  0x3a   :  { %3806 = shalt.err (!%p3803_p10)
}
  0x3b   :  { %69 = dma.hbm_to_vmem [thread:$0]  %s3947_s4, 16, %s67_s15, [#allocation9]  }
  0x3c   :  { %3827 = dma.done.wait [#allocation3], 1536  }
  0x3d   :  { %3828 = vsyncadd [#allocation3], 4294965760 }
  0x3e   :  { %3829 = dma.done.wait [#allocation6], 36960  }
  0x3f   :  { %3830 = vsyncadd [#allocation6], 4294930336 }
  0x40   :  { %3831 = dma.done.wait [#allocation9], 6160  }
  0x41   :  { %3832 = vsyncadd [#allocation9], 4294961136  ;;  %v3215_v0 = vld [vmem:[#allocation5 + $0x154] ss:$24 sps:$4 sm:$0xff]   ;;  %v3217_v1 = vld [vmem:[#allocation5 + $0x150] ss:$24 sps:$4 sm:$0xff]  }
  0x42   :  { %1864 = vmatprep.subr.bf16.mxu0 %v3215_v0  ;;  %v3218_v2 = vld [vmem:[#allocation5 + $0x454] ss:$24 sps:$4 sm:$0xff]   ;;  %v3220_v3 = vld [vmem:[#allocation5 + $0x450] ss:$24 sps:$4 sm:$0xff]   ;;  %v3221_v4 = vld [vmem:[#allocation5 + $0x124] ss:$24 sps:$4 sm:$0xff]  }
  0x43   :  { %1865 = vmatpush1.bf16.msra.mxu0 %v3217_v1  ;;  %v3223_v5 = vld [vmem:[#allocation5 + $0x120] ss:$24 sps:$4 sm:$0xff]   ;;  %1907 = vmatprep.subr.bf16.mxu1 %v3218_v2  ;;  %v3224_v6 = vld [vmem:[#allocation5 + $0x424] ss:$24 sps:$4 sm:$0xff]   ;;  %v3227_v8 = vld [vmem:[#allocation5 + $0xf4] ss:$24 sps:$4 sm:$0xff]  }
  0x44   :  { %1908 = vmatpush1.bf16.msra.mxu1 %v3220_v3  ;;  %1866 = vmatprep.subr.bf16.mxu0 %v3221_v4  ;;  %v3226_v7 = vld [vmem:[#allocation5 + $0x420] ss:$24 sps:$4 sm:$0xff]   ;;  %v3229_v9 = vld [vmem:[#allocation5 + $0xf0] ss:$24 sps:$4 sm:$0xff]   ;;  %v3230_v10 = vld [vmem:[#allocation5 + $0x3f4] ss:$24 sps:$4 sm:$0xff]  }
  0x45   :  { %1909 = vmatprep.subr.bf16.mxu1 %v3224_v6  ;;  %v3233_v11 = vld [vmem:[#allocation5 + $0xc4] ss:$24 sps:$4 sm:$0xff]   ;;  %v3232_v12 = vld [vmem:[#allocation5 + $0x3f0] ss:$24 sps:$4 sm:$0xff]   ;;  %v3235_v14 = vld [vmem:[#allocation5 + $0xc0] ss:$24 sps:$4 sm:$0xff]  }
  0x46   :  { %v3236_v13 = vld [vmem:[#allocation5 + $0x3c4] ss:$24 sps:$4 sm:$0xff]   ;;  %v3239_v15 = vld [vmem:[#allocation5 + $0x94] ss:$24 sps:$4 sm:$0xff]   ;;  %v3238_v16 = vld [vmem:[#allocation5 + $0x3c0] ss:$24 sps:$4 sm:$0xff]  }
  0x47   :  { %1867 = vmatpush1.bf16.msra.mxu0 %v3223_v5  ;;  %v3242_v17 = vld [vmem:[#allocation5 + $0x394] ss:$24 sps:$4 sm:$0xff]   ;;  %v3241_v18 = vld [vmem:[#allocation5 + $0x90] ss:$24 sps:$4 sm:$0xff]   ;;  %v3245_v19 = vld [vmem:[#allocation5 + $0x64] ss:$24 sps:$4 sm:$0xff]  }
  0x48   :  { %1868 = vmatprep.subr.bf16.mxu0 %v3227_v8  ;;  %1910 = vmatpush1.bf16.msra.mxu1 %v3226_v7  ;;  %v3244_v20 = vld [vmem:[#allocation5 + $0x390] ss:$24 sps:$4 sm:$0xff]   ;;  %v3248_v21 = vld [vmem:[#allocation5 + $0x364] ss:$24 sps:$4 sm:$0xff]   ;;  %v3247_v22 = vld [vmem:[#allocation5 + $0x60] ss:$24 sps:$4 sm:$0xff]  }
  0x49   :  { %1911 = vmatprep.subr.bf16.mxu1 %v3230_v10  ;;  %v3251_v23 = vld [vmem:[#allocation5 + $0x34] ss:$24 sps:$4 sm:$0xff]   ;;  %v3250_v24 = vld [vmem:[#allocation5 + $0x360] ss:$24 sps:$4 sm:$0xff]   ;;  %v3253_v26 = vld [vmem:[#allocation5 + $0x30] ss:$24 sps:$4 sm:$0xff]  }
  0x4a   :  { %v3254_v25 = vld [vmem:[#allocation5 + $0x334] ss:$24 sps:$4 sm:$0xff]   ;;  %v3257_v27 = vld [vmem:[#allocation5 + $0x4] ss:$24 sps:$4 sm:$0xff]   ;;  %v3256_v28 = vld [vmem:[#allocation5 + $0x330] ss:$24 sps:$4 sm:$0xff]  }
  0x4b   :  { %1869 = vmatpush1.bf16.msra.mxu0 %v3229_v9  ;;  %v3260_v29 = vld [vmem:[#allocation5 + $0x304] ss:$24 sps:$4 sm:$0xff]   ;;  %v3259_v30 = vld [vmem:[#allocation5] ss:$24 sps:$4 sm:$0xff]   ;;  %v3263_v31 = vld [vmem:[#allocation5 + $0x2d4] ss:$24 sps:$4 sm:$0xff]  }
  0x4c   :  { %1870 = vmatprep.subr.bf16.mxu0 %v3233_v11  ;;  %1912 = vmatpush1.bf16.msra.mxu1 %v3232_v12  ;;  %v3262_v32 = vld [vmem:[#allocation5 + $0x300] ss:$24 sps:$4 sm:$0xff]   ;;  %v3266_v33 = vld [vmem:[#allocation5 + $0x5d4] ss:$24 sps:$4 sm:$0xff]   ;;  %v3265_v34 = vld [vmem:[#allocation5 + $0x2d0] ss:$24 sps:$4 sm:$0xff]  }
  0x4d   :  { %1913 = vmatprep.subr.bf16.mxu1 %v3236_v13  ;;  %v3269_v35 = vld [vmem:[#allocation5 + $0x2a4] ss:$24 sps:$4 sm:$0xff]   ;;  %v3268_v36 = vld [vmem:[#allocation5 + $0x5d0] ss:$24 sps:$4 sm:$0xff]   ;;  %v3271_v38 = vld [vmem:[#allocation5 + $0x2a0] ss:$24 sps:$4 sm:$0xff]  }
  0x4e   :  { %v3272_v37 = vld [vmem:[#allocation5 + $0x5a4] ss:$24 sps:$4 sm:$0xff]   ;;  %v3275_v39 = vld [vmem:[#allocation5 + $0x274] ss:$24 sps:$4 sm:$0xff]   ;;  %v3274_v40 = vld [vmem:[#allocation5 + $0x5a0] ss:$24 sps:$4 sm:$0xff]  }
  0x4f   :  { %1871 = vmatpush1.bf16.msra.mxu0 %v3235_v14  ;;  %v3278_v41 = vld [vmem:[#allocation5 + $0x574] ss:$24 sps:$4 sm:$0xff]   ;;  %v3277_v42 = vld [vmem:[#allocation5 + $0x270] ss:$24 sps:$4 sm:$0xff]   ;;  %v3281_v43 = vld [vmem:[#allocation5 + $0x244] ss:$24 sps:$4 sm:$0xff]  }
  0x50   :  { %1872 = vmatprep.subr.bf16.mxu0 %v3239_v15  ;;  %1914 = vmatpush1.bf16.msra.mxu1 %v3238_v16  ;;  %v3280_v44 = vld [vmem:[#allocation5 + $0x570] ss:$24 sps:$4 sm:$0xff]   ;;  %v3284_v45 = vld [vmem:[#allocation5 + $0x544] ss:$24 sps:$4 sm:$0xff]   ;;  %v3283_v48 = vld [vmem:[#allocation5 + $0x240] ss:$24 sps:$4 sm:$0xff]  }
  0x51   :  { %1915 = vmatprep.subr.bf16.mxu1 %v3242_v17  ;;  %v87_v46 = vld [vmem:[#allocation2 + $0x8] sm:$0xff]  ;;  %v93_v47 = vld [vmem:[#allocation2 + $0x38] sm:$0xff]  ;;  %v86_v5 = vld [vmem:[#allocation2] sm:$0xff]  ;;  %s3846_s2 = smov [#allocation11]  }
  0x52   :  { %v3894_v49 = vpack.c.bf16 %v93_v47, %v87_v46  ;;  %v3287_v50 = vld [vmem:[#allocation5 + $0x214] ss:$24 sps:$4 sm:$0xff]   ;;  %v3286_v51 = vld [vmem:[#allocation5 + $0x540] ss:$24 sps:$4 sm:$0xff]   ;;  %v3289_v56 = vld [vmem:[#allocation5 + $0x210] ss:$24 sps:$4 sm:$0xff]  }
  0x53   :  { %1873 = vmatpush1.bf16.msra.mxu0 %v3241_v18  ;;  %v89_v52 = vld [vmem:[#allocation2 + $0x18] sm:$0xff]  ;;  %v95_v53 = vld [vmem:[#allocation2 + $0x48] sm:$0xff]  ;;  %v92_v7 = vld [vmem:[#allocation2 + $0x30] sm:$0xff]  ;;  %s2784_s4 = sshll.u32 %s3846_s2, 4  ;;  %s2785_s4 = int_to_ptr.vmem [resolvable:$true] %s2784_s4 }
  0x54   :  { %1874 = vmatprep.subr.bf16.mxu0 %v3245_v19  ;;  %1916 = vmatpush1.bf16.msra.mxu1 %v3244_v20  ;;  %v3290_v54 = vld [vmem:[#allocation5 + $0x514] ss:$24 sps:$4 sm:$0xff]   ;;  %v3897_v55 = vpack.c.bf16 %v95_v53, %v89_v52  ;;  %v3293_v57 = vld [vmem:[#allocation5 + $0x1e4] ss:$24 sps:$4 sm:$0xff]   ;;  %v3292_v58 = vld [vmem:[#allocation5 + $0x510] ss:$24 sps:$4 sm:$0xff]   ;;  %v3900_v11 = vpack.c.bf16 %v92_v7, %v86_v5  ;;  %p3812_p12 = scmp.lt.s32.totalorder %s2785_s4, %s2785_s4 }
  0x55   :  { %1917 = vmatprep.subr.bf16.mxu1 %v3248_v21  ;;  %1896 = vmatprep.mubr.bf16.mxu0 %v3894_v49  ;;  %v3296_v59 = vld [vmem:[#allocation5 + $0x4e4] ss:$24 sps:$4 sm:$0xff]   ;;  %v3295_v60 = vld [vmem:[#allocation5 + $0x1e0] ss:$24 sps:$4 sm:$0xff]   ;;  %v3299_v61 = vld [vmem:[#allocation5 + $0x1b4] ss:$24 sps:$4 sm:$0xff]  }
  0x56   :  { %1939 = vmatprep.mubr.bf16.mxu1 %v3897_v55  ;;  %v3298_v62 = vld [vmem:[#allocation5 + $0x4e0] ss:$24 sps:$4 sm:$0xff]   ;;  %v3302_v63 = vld [vmem:[#allocation5 + $0x4b4] ss:$24 sps:$4 sm:$0xff]   ;;  %v3301_v0 = vld [vmem:[#allocation5 + $0x1b0] ss:$24 sps:$4 sm:$0xff]  }
  0x57   :  { %1875 = vmatpush1.bf16.msra.mxu0 %v3247_v22  ;;  %v3304_v1 = vld [vmem:[#allocation5 + $0x4b0] ss:$24 sps:$4 sm:$0xff]   ;;  %v3305_v2 = vld [vmem:[#allocation5 + $0x184] ss:$24 sps:$4 sm:$0xff]   ;;  %v3307_v3 = vld [vmem:[#allocation5 + $0x180] ss:$24 sps:$4 sm:$0xff]  }
  0x58   :  { %1876 = vmatprep.subr.bf16.mxu0 %v3251_v23  ;;  %1918 = vmatpush1.bf16.msra.mxu1 %v3250_v24  ;;  %v3308_v4 = vld [vmem:[#allocation5 + $0x484] ss:$24 sps:$4 sm:$0xff]   ;;  %v3310_v6 = vld [vmem:[#allocation5 + $0x480] ss:$24 sps:$4 sm:$0xff]   ;;  %v3313_v8 = vld [vmem:[#allocation5 + $0x754] ss:$24 sps:$4 sm:$0xff]  }
  0x59   :  { %1919 = vmatprep.subr.bf16.mxu1 %v3254_v25  ;;  %v88_v9 = vld [vmem:[#allocation2 + $0x10] sm:$0xff]  ;;  %v94_v10 = vld [vmem:[#allocation2 + $0x40] sm:$0xff]  ;;  %s3807_s22 = scalar_lea.vmem %s2785_s4, 256 }
  0x5a   :  { %v3316_v12 = vld [vmem:[#allocation5 + $0x15c] ss:$24 sps:$4 sm:$0xff]   ;;  %v3311_v13 = vld [vmem:[#allocation5 + $0x750] ss:$24 sps:$4 sm:$0xff]   ;;  %v3902_v14 = vpack.c.bf16 %v94_v10, %v88_v9  ;;  %v3322_v17 = vld [vmem:[#allocation5 + $0x12c] ss:$24 sps:$4 sm:$0xff]   ;;  %p3808_p11 = scmp.ne.s32.totalorder %s2785_s4, %s3807_s22  ;;  %p3813_p13 = scmp.lt.s32.totalorder %s3807_s22, %s3807_s22 }
  0x5b   :  { %1877 = vmatpush1.bf16.msra.mxu0 %v3253_v26  ;;  %v3319_v15 = vld [vmem:[#allocation5 + $0x724] ss:$24 sps:$4 sm:$0xff]   ;;  %v3314_v16 = vld [vmem:[#allocation5 + $0x158] ss:$24 sps:$4 sm:$0xff]   ;;  %v3325_v19 = vld [vmem:[#allocation5 + $0x6f4] ss:$24 sps:$4 sm:$0xff]  }
  0x5c   :  { %1878 = vmatprep.subr.bf16.mxu0 %v3257_v27  ;;  %1920 = vmatpush1.bf16.msra.mxu1 %v3256_v28  ;;  %v3317_v18 = vld [vmem:[#allocation5 + $0x720] ss:$24 sps:$4 sm:$0xff]   ;;  %v3328_v21 = vld [vmem:[#allocation5 + $0xfc] ss:$24 sps:$4 sm:$0xff]   ;;  %v3323_v22 = vld [vmem:[#allocation5 + $0x6f0] ss:$24 sps:$4 sm:$0xff]   ;;  %p3814_p0 = por %p3813_p13, %p3812_p12 }
  0x5d   :  { %1921 = vmatprep.subr.bf16.mxu1 %v3260_v29  ;;  %v3320_v20 = vld [vmem:[#allocation5 + $0x128] ss:$24 sps:$4 sm:$0xff]   ;;  %v3331_v23 = vld [vmem:[#allocation5 + $0x6c4] ss:$24 sps:$4 sm:$0xff]   ;;  %v3326_v24 = vld [vmem:[#allocation5 + $0xf8] ss:$24 sps:$4 sm:$0xff]  }
  0x5e   :  { %v3334_v25 = vld [vmem:[#allocation5 + $0xcc] ss:$24 sps:$4 sm:$0xff]   ;;  %v3329_v26 = vld [vmem:[#allocation5 + $0x6c0] ss:$24 sps:$4 sm:$0xff]   ;;  %v3340_v29 = vld [vmem:[#allocation5 + $0x9c] ss:$24 sps:$4 sm:$0xff]   ;;  %p3815_p1 = pnand %p3814_p0, %p3808_p11 }
  0x5f   :  { %1879 = vmatpush1.bf16.msra.mxu0 %v3259_v30  ;;  %v3337_v27 = vld [vmem:[#allocation5 + $0x694] ss:$24 sps:$4 sm:$0xff]   ;;  %v3332_v28 = vld [vmem:[#allocation5 + $0xc8] ss:$24 sps:$4 sm:$0xff]   ;;  %v3362_v52 = vld [vmem:[#allocation5 + $0x2d8] ss:$24 sps:$4 sm:$0xff]  }
  0x60   :  { %1880 = vmatprep.subr.bf16.mxu0 %v3263_v31  ;;  %1922 = vmatpush1.bf16.msra.mxu1 %v3262_v32  ;;  %v3335_v30 = vld [vmem:[#allocation5 + $0x690] ss:$24 sps:$4 sm:$0xff]   ;;  %v3343_v31 = vld [vmem:[#allocation5 + $0x664] ss:$24 sps:$4 sm:$0xff]   ;;  %v3361_v46 = vld [vmem:[#allocation5 + $0x8d4] ss:$24 sps:$4 sm:$0xff]  }
  0x61   :  { %1923 = vmatprep.subr.bf16.mxu1 %v3266_v33  ;;  %v3338_v32 = vld [vmem:[#allocation5 + $0x98] ss:$24 sps:$4 sm:$0xff]   ;;  %v3346_v33 = vld [vmem:[#allocation5 + $0x6c] ss:$24 sps:$4 sm:$0xff]   ;;  %v3356_v47 = vld [vmem:[#allocation5 + $0x8] ss:$24 sps:$4 sm:$0xff]  }
  0x62   :  { %v3370_v53 = vld [vmem:[#allocation5 + $0x2ac] ss:$24 sps:$4 sm:$0xff]   ;;  %v3386_v5 = vld [vmem:[#allocation5 + $0x218] ss:$24 sps:$4 sm:$0xff]   ;;  %v3392_v9 = vld [vmem:[#allocation5 + $0x1e8] ss:$24 sps:$4 sm:$0xff]  }
  0x63   :  { %1881 = vmatpush2.bf16.msra.mxu0 %v3265_v34  ;;  %v3341_v34 = vld [vmem:[#allocation5 + $0x660] ss:$24 sps:$4 sm:$0xff]   ;;  %v3400_v10 = vld [vmem:[#allocation5 + $0x1bc] ss:$24 sps:$4 sm:$0xff]  }
  0x64   :  { %1882 = vmatprep.subr.bf16.mxu0 %v3269_v35  ;;  %1924 = vmatpush2.bf16.msra.mxu1 %v3268_v36  ;;  %v3349_v35 = vld [vmem:[#allocation5 + $0x634] ss:$24 sps:$4 sm:$0xff]   ;;  %v3344_v36 = vld [vmem:[#allocation5 + $0x68] ss:$24 sps:$4 sm:$0xff]  }
  0x65   :  { %1925 = vmatprep.subr.bf16.mxu1 %v3272_v37  ;;  %v3352_v37 = vld [vmem:[#allocation5 + $0x3c] ss:$24 sps:$4 sm:$0xff]   ;;  %v3389_v7 = vld [vmem:[#allocation5 + $0x7e0] ss:$24 sps:$4 sm:$0xff]  }
  0x67   :  { %1883 = vmatpush2.bf16.msra.mxu0 %v3271_v38  ;;  %v3347_v38 = vld [vmem:[#allocation5 + $0x630] ss:$24 sps:$4 sm:$0xff]  }
  0x68   :  { %1884 = vmatprep.subr.bf16.mxu0 %v3275_v39  ;;  %1926 = vmatpush2.bf16.msra.mxu1 %v3274_v40  ;;  %v3355_v39 = vld [vmem:[#allocation5 + $0x604] ss:$24 sps:$4 sm:$0xff]   ;;  %v91_v40 = vld [vmem:[#allocation2 + $0x28] sm:$0xff] }
  0x69   :  { %1927 = vmatprep.subr.bf16.mxu1 %v3278_v41  ;;  %v97_v41 = vld [vmem:[#allocation2 + $0x58] sm:$0xff] }
  0x6b   :  { %1885 = vmatpush2.bf16.msra.mxu0 %v3277_v42  ;;  %v3350_v42 = vld [vmem:[#allocation5 + $0x38] ss:$24 sps:$4 sm:$0xff]  }
  0x6c   :  { %1886 = vmatprep.subr.bf16.mxu0 %v3281_v43  ;;  %1928 = vmatpush2.bf16.msra.mxu1 %v3280_v44  ;;  %v3907_v43 = vpack.c.bf16 %v97_v41, %v91_v40  ;;  %v3358_v44 = vld [vmem:[#allocation5 + $0xc] ss:$24 sps:$4 sm:$0xff]   ;;  %v3431_v40 = vld [vmem:[#allocation5 + $0x398] ss:$24 sps:$4 sm:$0xff]  }
  0x6d   :  { %1929 = vmatprep.subr.bf16.mxu1 %v3284_v45  ;;  %v3353_v45 = vld [vmem:[#allocation5 + $0x600] ss:$24 sps:$4 sm:$0xff]   ;;  %v3439_v41 = vld [vmem:[#allocation5 + $0x36c] ss:$24 sps:$4 sm:$0xff]  }
  0x6f   :  { %1887 = vmatpush2.bf16.msra.mxu0 %v3283_v48  ;;  %v3364_v48 = vld [vmem:[#allocation5 + $0x2dc] ss:$24 sps:$4 sm:$0xff]  }
  0x70   :  { %1888 = vmatprep.subr.bf16.mxu0 %v3287_v50  ;;  %1930 = vmatpush2.bf16.msra.mxu1 %v3286_v51  ;;  %v3359_v50 = vld [vmem:[#allocation5 + $0x8d0] ss:$24 sps:$4 sm:$0xff]   ;;  %v3367_v51 = vld [vmem:[#allocation5 + $0x8a4] ss:$24 sps:$4 sm:$0xff]  }
  0x71   :  { %1931 = vmatprep.subr.bf16.mxu1 %v3290_v54  ;;  %v3365_v54 = vld [vmem:[#allocation5 + $0x8a0] ss:$24 sps:$4 sm:$0xff]  }
  0x73   :  { %1889 = vmatpush2.bf16.msra.mxu0 %v3289_v56  ;;  %v3373_v56 = vld [vmem:[#allocation5 + $0x874] ss:$24 sps:$4 sm:$0xff]  }
  0x74   :  { %1890 = vmatprep.subr.bf16.mxu0 %v3293_v57  ;;  %1932 = vmatpush2.bf16.msra.mxu1 %v3292_v58  ;;  %v3368_v57 = vld [vmem:[#allocation5 + $0x2a8] ss:$24 sps:$4 sm:$0xff]   ;;  %v3376_v58 = vld [vmem:[#allocation5 + $0x27c] ss:$24 sps:$4 sm:$0xff]  }
  0x75   :  { %1933 = vmatprep.subr.bf16.mxu1 %v3296_v59  ;;  %v3371_v59 = vld [vmem:[#allocation5 + $0x870] ss:$24 sps:$4 sm:$0xff]  }
  0x77   :  { %1891 = vmatpush2.bf16.msra.mxu0 %v3295_v60  ;;  %v3379_v60 = vld [vmem:[#allocation5 + $0x844] ss:$24 sps:$4 sm:$0xff]  }
  0x78   :  { %1892 = vmatprep.subr.bf16.mxu0 %v3299_v61  ;;  %1934 = vmatpush2.bf16.msra.mxu1 %v3298_v62  ;;  %v3374_v61 = vld [vmem:[#allocation5 + $0x278] ss:$24 sps:$4 sm:$0xff]   ;;  %v3382_v62 = vld [vmem:[#allocation5 + $0x24c] ss:$24 sps:$4 sm:$0xff]  }
  0x79   :  { %1935 = vmatprep.subr.bf16.mxu1 %v3302_v63  ;;  %v3377_v63 = vld [vmem:[#allocation5 + $0x840] ss:$24 sps:$4 sm:$0xff]  }
  0x7b   :  { %1893 = vmatpush2.bf16.msra.mxu0 %v3301_v0  ;;  %v3385_v0 = vld [vmem:[#allocation5 + $0x814] ss:$24 sps:$4 sm:$0xff]  }
  0x7c   :  { %1894 = vmatprep.subr.bf16.mxu0 %v3305_v2  ;;  %1936 = vmatpush2.bf16.msra.mxu1 %v3304_v1  ;;  %v3380_v1 = vld [vmem:[#allocation5 + $0x248] ss:$24 sps:$4 sm:$0xff]   ;;  %v3388_v2 = vld [vmem:[#allocation5 + $0x21c] ss:$24 sps:$4 sm:$0xff]  }
  0x7d   :  { %1937 = vmatprep.subr.bf16.mxu1 %v3308_v4  ;;  %v3391_v4 = vld [vmem:[#allocation5 + $0x7e4] ss:$24 sps:$4 sm:$0xff]  }
  0x7f   :  { %1895 = vmatpush2.bf16.msra.mxu0 %v3307_v3  ;;  %v3383_v3 = vld [vmem:[#allocation5 + $0x810] ss:$24 sps:$4 sm:$0xff]  }
  0x80   :  { %1950 = vmatprep.subr.bf16.mxu0 %v3313_v8  ;;  %1938 = vmatpush2.bf16.msra.mxu1 %v3310_v6  ;;  %v3394_v6 = vld [vmem:[#allocation5 + $0x1ec] ss:$24 sps:$4 sm:$0xff]  }
  0x81   :  { %1993 = vmatprep.subr.bf16.mxu1 %v3316_v12  ;;  %v3397_v8 = vld [vmem:[#allocation5 + $0x7b4] ss:$24 sps:$4 sm:$0xff]   ;;  %v3395_v12 = vld [vmem:[#allocation5 + $0x7b0] ss:$24 sps:$4 sm:$0xff]  }
  0x82   :  { %1897 = vmatmul.mubr.bf16.vlgmr.msra.gmra.mxu0 %v3900_v11 }
  0x83   :  { %1951 = vmatpush1.bf16.msra.mxu0 %v3311_v13  ;;  %1940 = vmatmul.mubr.bf16.vlgmr.msra.gmra.mxu1 %v3902_v14  ;;  %v3403_v13 = vld [vmem:[#allocation5 + $0x784] ss:$24 sps:$4 sm:$0xff]  }
  0x84   :  { %1952 = vmatprep.subr.bf16.mxu0 %v3319_v15  ;;  %1994 = vmatpush1.bf16.msra.mxu1 %v3314_v16  ;;  %v3398_v15 = vld [vmem:[#allocation5 + $0x1b8] ss:$24 sps:$4 sm:$0xff]  }
  0x85   :  { %2025 = vmatprep.mubr.bf16.mxu1 %v3894_v49  ;;  %1995 = vmatprep.subr.bf16.mxu1 %v3322_v17  ;;  %v3401_v16 = vld [vmem:[#allocation5 + $0x780] ss:$24 sps:$4 sm:$0xff]   ;;  %v3406_v17 = vld [vmem:[#allocation5 + $0x18c] ss:$24 sps:$4 sm:$0xff]  }
  0x86   :  { %1982 = vmatprep.mubr.bf16.mxu0 %v3907_v43 }
  0x87   :  { %1953 = vmatpush1.bf16.msra.mxu0 %v3317_v18  ;;  %v90_v18 = vld [vmem:[#allocation2 + $0x20] sm:$0xff] }
  0x88   :  { %1954 = vmatprep.subr.bf16.mxu0 %v3325_v19  ;;  %1996 = vmatpush1.bf16.msra.mxu1 %v3320_v20  ;;  %v96_v19 = vld [vmem:[#allocation2 + $0x50] sm:$0xff] }
  0x89   :  { %1997 = vmatprep.subr.bf16.mxu1 %v3328_v21  ;;  %v3409_v20 = vld [vmem:[#allocation5 + $0x45c] ss:$24 sps:$4 sm:$0xff]   ;;  %v3404_v21 = vld [vmem:[#allocation5 + $0x188] ss:$24 sps:$4 sm:$0xff]  }
  0x8b   :  { %1955 = vmatpush1.bf16.msra.mxu0 %v3323_v22  ;;  %v3910_v22 = vpack.c.bf16 %v96_v19, %v90_v18  ;;  %v3493_v18 = vld [vmem:[#allocation5 + $0x4bc] ss:$24 sps:$4 sm:$0xff]   ;;  %v3488_v19 = vld [vmem:[#allocation5 + $0x7e8] ss:$24 sps:$4 sm:$0xff]  }
  0x8c   :  { %1956 = vmatprep.subr.bf16.mxu0 %v3331_v23  ;;  %1998 = vmatpush1.bf16.msra.mxu1 %v3326_v24  ;;  %v3412_v23 = vld [vmem:[#allocation5 + $0x75c] ss:$24 sps:$4 sm:$0xff]   ;;  %v3407_v24 = vld [vmem:[#allocation5 + $0x458] ss:$24 sps:$4 sm:$0xff]  }
  0x8d   :  { %1999 = vmatprep.subr.bf16.mxu1 %v3334_v25  ;;  %v3415_v25 = vld [vmem:[#allocation5 + $0x42c] ss:$24 sps:$4 sm:$0xff]  }
  0x8f   :  { %1957 = vmatpush1.bf16.msra.mxu0 %v3329_v26  ;;  %v3410_v26 = vld [vmem:[#allocation5 + $0x758] ss:$24 sps:$4 sm:$0xff]  }
  0x90   :  { %1958 = vmatprep.subr.bf16.mxu0 %v3337_v27  ;;  %2000 = vmatpush1.bf16.msra.mxu1 %v3332_v28  ;;  %v3418_v27 = vld [vmem:[#allocation5 + $0x72c] ss:$24 sps:$4 sm:$0xff]   ;;  %v3413_v28 = vld [vmem:[#allocation5 + $0x428] ss:$24 sps:$4 sm:$0xff]  }
  0x91   :  { %2001 = vmatprep.subr.bf16.mxu1 %v3340_v29  ;;  %v3421_v29 = vld [vmem:[#allocation5 + $0x3fc] ss:$24 sps:$4 sm:$0xff]  }
  0x93   :  { %1959 = vmatpush1.bf16.msra.mxu0 %v3335_v30  ;;  %v3416_v30 = vld [vmem:[#allocation5 + $0x728] ss:$24 sps:$4 sm:$0xff]  }
  0x94   :  { %1960 = vmatprep.subr.bf16.mxu0 %v3343_v31  ;;  %2002 = vmatpush1.bf16.msra.mxu1 %v3338_v32  ;;  %v3424_v31 = vld [vmem:[#allocation5 + $0x6fc] ss:$24 sps:$4 sm:$0xff]   ;;  %v3419_v32 = vld [vmem:[#allocation5 + $0x3f8] ss:$24 sps:$4 sm:$0xff]  }
  0x95   :  { %2003 = vmatprep.subr.bf16.mxu1 %v3346_v33  ;;  %v3427_v33 = vld [vmem:[#allocation5 + $0x3cc] ss:$24 sps:$4 sm:$0xff]  }
  0x97   :  { %1961 = vmatpush1.bf16.msra.mxu0 %v3341_v34  ;;  %v3422_v34 = vld [vmem:[#allocation5 + $0x6f8] ss:$24 sps:$4 sm:$0xff]  }
  0x98   :  { %1962 = vmatprep.subr.bf16.mxu0 %v3349_v35  ;;  %2004 = vmatpush1.bf16.msra.mxu1 %v3344_v36  ;;  %v3430_v35 = vld [vmem:[#allocation5 + $0x6cc] ss:$24 sps:$4 sm:$0xff]   ;;  %v3425_v36 = vld [vmem:[#allocation5 + $0x3c8] ss:$24 sps:$4 sm:$0xff]  }
  0x99   :  { %2005 = vmatprep.subr.bf16.mxu1 %v3352_v37  ;;  %v3433_v37 = vld [vmem:[#allocation5 + $0x39c] ss:$24 sps:$4 sm:$0xff]  }
  0x9b   :  { %1963 = vmatpush1.bf16.msra.mxu0 %v3347_v38  ;;  %v3428_v38 = vld [vmem:[#allocation5 + $0x6c8] ss:$24 sps:$4 sm:$0xff]  }
  0x9c   :  { %1964 = vmatprep.subr.bf16.mxu0 %v3355_v39  ;;  %2006 = vmatpush1.bf16.msra.mxu1 %v3350_v42  ;;  %v3436_v39 = vld [vmem:[#allocation5 + $0x69c] ss:$24 sps:$4 sm:$0xff]   ;;  %v3434_v42 = vld [vmem:[#allocation5 + $0x698] ss:$24 sps:$4 sm:$0xff]  }
  0x9d   :  { %2007 = vmatprep.subr.bf16.mxu1 %v3358_v44  ;;  %v3442_v44 = vld [vmem:[#allocation5 + $0x66c] ss:$24 sps:$4 sm:$0xff]  }
  0x9f   :  { %1965 = vmatpush1.bf16.msra.mxu0 %v3353_v45  ;;  %v3437_v45 = vld [vmem:[#allocation5 + $0x368] ss:$24 sps:$4 sm:$0xff]  }
  0xa0   :  { %1966 = vmatprep.subr.bf16.mxu0 %v3361_v46  ;;  %2008 = vmatpush1.bf16.msra.mxu1 %v3356_v47  ;;  %v3445_v46 = vld [vmem:[#allocation5 + $0x33c] ss:$24 sps:$4 sm:$0xff]   ;;  %v3440_v47 = vld [vmem:[#allocation5 + $0x668] ss:$24 sps:$4 sm:$0xff]  }
  0xa1   :  { %2009 = vmatprep.subr.bf16.mxu1 %v3364_v48  ;;  %v3448_v48 = vld [vmem:[#allocation5 + $0x63c] ss:$24 sps:$4 sm:$0xff]  }
  0xa3   :  { %1967 = vmatpush2.bf16.msra.mxu0 %v3359_v50  ;;  %v3443_v50 = vld [vmem:[#allocation5 + $0x338] ss:$24 sps:$4 sm:$0xff]  }
  0xa4   :  { %1968 = vmatprep.subr.bf16.mxu0 %v3367_v51  ;;  %2010 = vmatpush2.bf16.msra.mxu1 %v3362_v52  ;;  %v3451_v51 = vld [vmem:[#allocation5 + $0x30c] ss:$24 sps:$4 sm:$0xff]   ;;  %v3446_v52 = vld [vmem:[#allocation5 + $0x638] ss:$24 sps:$4 sm:$0xff]  }
  0xa5   :  { %2011 = vmatprep.subr.bf16.mxu1 %v3370_v53  ;;  %v3454_v53 = vld [vmem:[#allocation5 + $0x60c] ss:$24 sps:$4 sm:$0xff]  }
  0xa7   :  { %1969 = vmatpush2.bf16.msra.mxu0 %v3365_v54  ;;  %v3449_v54 = vld [vmem:[#allocation5 + $0x308] ss:$24 sps:$4 sm:$0xff]  }
  0xa8   :  { %1970 = vmatprep.subr.bf16.mxu0 %v3373_v56  ;;  %2012 = vmatpush2.bf16.msra.mxu1 %v3368_v57  ;;  %v3457_v56 = vld [vmem:[#allocation5 + $0x5dc] ss:$24 sps:$4 sm:$0xff]   ;;  %v3452_v57 = vld [vmem:[#allocation5 + $0x608] ss:$24 sps:$4 sm:$0xff]  }
  0xa9   :  { %2013 = vmatprep.subr.bf16.mxu1 %v3376_v58  ;;  %v3460_v58 = vld [vmem:[#allocation5 + $0x8dc] ss:$24 sps:$4 sm:$0xff]  }
  0xab   :  { %1971 = vmatpush2.bf16.msra.mxu0 %v3371_v59  ;;  %v3455_v59 = vld [vmem:[#allocation5 + $0x5d8] ss:$24 sps:$4 sm:$0xff]  }
  0xac   :  { %1972 = vmatprep.subr.bf16.mxu0 %v3379_v60  ;;  %2014 = vmatpush2.bf16.msra.mxu1 %v3374_v61  ;;  %v3463_v60 = vld [vmem:[#allocation5 + $0x5ac] ss:$24 sps:$4 sm:$0xff]   ;;  %v3458_v61 = vld [vmem:[#allocation5 + $0x8d8] ss:$24 sps:$4 sm:$0xff]  }
  0xad   :  { %2015 = vmatprep.subr.bf16.mxu1 %v3382_v62  ;;  %v3466_v62 = vld [vmem:[#allocation5 + $0x8ac] ss:$24 sps:$4 sm:$0xff]  }
  0xaf   :  { %1973 = vmatpush2.bf16.msra.mxu0 %v3377_v63  ;;  %v3461_v63 = vld [vmem:[#allocation5 + $0x5a8] ss:$24 sps:$4 sm:$0xff]  }
  0xb0   :  { %1974 = vmatprep.subr.bf16.mxu0 %v3385_v0  ;;  %2016 = vmatpush2.bf16.msra.mxu1 %v3380_v1  ;;  %v3469_v0 = vld [vmem:[#allocation5 + $0x57c] ss:$24 sps:$4 sm:$0xff]   ;;  %v3464_v1 = vld [vmem:[#allocation5 + $0x8a8] ss:$24 sps:$4 sm:$0xff]  }
  0xb1   :  { %2017 = vmatprep.subr.bf16.mxu1 %v3388_v2  ;;  %v3472_v2 = vld [vmem:[#allocation5 + $0x87c] ss:$24 sps:$4 sm:$0xff]  }
  0xb3   :  { %1975 = vmatpush2.bf16.msra.mxu0 %v3383_v3  ;;  %v3467_v3 = vld [vmem:[#allocation5 + $0x578] ss:$24 sps:$4 sm:$0xff]  }
  0xb4   :  { %1976 = vmatprep.subr.bf16.mxu0 %v3391_v4  ;;  %2018 = vmatpush2.bf16.msra.mxu1 %v3386_v5  ;;  %v3475_v4 = vld [vmem:[#allocation5 + $0x54c] ss:$24 sps:$4 sm:$0xff]   ;;  %v3470_v5 = vld [vmem:[#allocation5 + $0x878] ss:$24 sps:$4 sm:$0xff]  }
  0xb5   :  { %2019 = vmatprep.subr.bf16.mxu1 %v3394_v6  ;;  %v3478_v6 = vld [vmem:[#allocation5 + $0x84c] ss:$24 sps:$4 sm:$0xff]  }
  0xb7   :  { %1977 = vmatpush2.bf16.msra.mxu0 %v3389_v7  ;;  %v3473_v7 = vld [vmem:[#allocation5 + $0x548] ss:$24 sps:$4 sm:$0xff]  }
  0xb8   :  { %1978 = vmatprep.subr.bf16.mxu0 %v3397_v8  ;;  %2020 = vmatpush2.bf16.msra.mxu1 %v3392_v9  ;;  %v3481_v8 = vld [vmem:[#allocation5 + $0x51c] ss:$24 sps:$4 sm:$0xff]   ;;  %v3476_v9 = vld [vmem:[#allocation5 + $0x848] ss:$24 sps:$4 sm:$0xff]  }
  0xb9   :  { %2021 = vmatprep.subr.bf16.mxu1 %v3400_v10  ;;  %v3484_v10 = vld [vmem:[#allocation5 + $0x81c] ss:$24 sps:$4 sm:$0xff]  }
  0xbb   :  { %1979 = vmatpush2.bf16.msra.mxu0 %v3395_v12  ;;  %v3479_v12 = vld [vmem:[#allocation5 + $0x518] ss:$24 sps:$4 sm:$0xff]  }
  0xbc   :  { %1980 = vmatprep.subr.bf16.mxu0 %v3403_v13  ;;  %2022 = vmatpush2.bf16.msra.mxu1 %v3398_v15  ;;  %v3487_v13 = vld [vmem:[#allocation5 + $0x4ec] ss:$24 sps:$4 sm:$0xff]   ;;  %v3482_v15 = vld [vmem:[#allocation5 + $0x818] ss:$24 sps:$4 sm:$0xff]  }
  0xbd   :  { %2023 = vmatprep.subr.bf16.mxu1 %v3406_v17  ;;  %v3485_v17 = vld [vmem:[#allocation5 + $0x4e8] ss:$24 sps:$4 sm:$0xff]  }
  0xbf   :  { %1981 = vmatpush2.bf16.msra.mxu0 %v3401_v16  ;;  %v3490_v16 = vld [vmem:[#allocation5 + $0x7ec] ss:$24 sps:$4 sm:$0xff]  }
  0xc0   :  { %2036 = vmatprep.subr.bf16.mxu0 %v3409_v20  ;;  %2024 = vmatpush2.bf16.msra.mxu1 %v3404_v21  ;;  %v3496_v20 = vld [vmem:[#allocation5 + $0x7bc] ss:$24 sps:$4 sm:$0xff]   ;;  %v3491_v21 = vld [vmem:[#allocation5 + $0x4b8] ss:$24 sps:$4 sm:$0xff]  }
  0xc1   :  { %2079 = vmatprep.subr.bf16.mxu1 %v3412_v23  ;;  %v3499_v23 = vld [vmem:[#allocation5 + $0x48c] ss:$24 sps:$4 sm:$0xff]  }
  0xc2   :  { %1983 = vmatmul.mubr.bf16.vlgmr.msra.gmra.mxu0 %v3910_v22 }
  0xc3   :  { %2037 = vmatpush1.bf16.msra.mxu0 %v3407_v24  ;;  %2068 = vmatprep.mubr.bf16.mxu0 %v3897_v55  ;;  %v3494_v24 = vld [vmem:[#allocation5 + $0x7b8] ss:$24 sps:$4 sm:$0xff]  }
  0xc4   :  { %2026 = vmatmul.mubr.bf16.vlgmr.msra.gmra.mxu1 %v3900_v11  ;;  %2038 = vmatprep.subr.bf16.mxu0 %v3415_v25  ;;  %v3502_v25 = vld [vmem:[#allocation5 + $0x78c] ss:$24 sps:$4 sm:$0xff]  }
  0xc5   :  { %2080 = vmatpush1.bf16.msra.mxu1 %v3410_v26  ;;  %2111 = vmatprep.mubr.bf16.mxu1 %v3907_v43  ;;  %v3497_v26 = vld [vmem:[#allocation5 + $0x488] ss:$24 sps:$4 sm:$0xff]  }
  0xc6   :  { %2081 = vmatprep.subr.bf16.mxu1 %v3418_v27  ;;  %v3505_v27 = vld [vmem:[#allocation5 + $0x164] ss:$24 sps:$4 sm:$0xff]  }
  0xc7   :  { %2039 = vmatpush1.bf16.msra.mxu0 %v3413_v28  ;;  %v3500_v28 = vld [vmem:[#allocation5 + $0x788] ss:$24 sps:$4 sm:$0xff]  }
  0xc8   :  { %2040 = vmatprep.subr.bf16.mxu0 %v3421_v29  ;;  %v3508_v29 = vld [vmem:[#allocation5 + $0x464] ss:$24 sps:$4 sm:$0xff]  }
  0xc9   :  { %2082 = vmatpush1.bf16.msra.mxu1 %v3416_v30  ;;  %v3503_v30 = vld [vmem:[#allocation5 + $0x160] ss:$24 sps:$4 sm:$0xff]  }
  0xca   :  { %2083 = vmatprep.subr.bf16.mxu1 %v3424_v31  ;;  %v3511_v31 = vld [vmem:[#allocation5 + $0x134] ss:$24 sps:$4 sm:$0xff]  }
  0xcb   :  { %2041 = vmatpush1.bf16.msra.mxu0 %v3419_v32  ;;  %v3506_v32 = vld [vmem:[#allocation5 + $0x460] ss:$24 sps:$4 sm:$0xff]  }
  0xcc   :  { %2042 = vmatprep.subr.bf16.mxu0 %v3427_v33  ;;  %v3509_v33 = vld [vmem:[#allocation5 + $0x130] ss:$24 sps:$4 sm:$0xff]  }
  0xcd   :  { %2084 = vmatpush1.bf16.msra.mxu1 %v3422_v34  ;;  %v3514_v34 = vld [vmem:[#allocation5 + $0x434] ss:$24 sps:$4 sm:$0xff]  }
  0xce   :  { %2085 = vmatprep.subr.bf16.mxu1 %v3430_v35  ;;  %v3512_v35 = vld [vmem:[#allocation5 + $0x430] ss:$24 sps:$4 sm:$0xff]  }
  0xcf   :  { %2043 = vmatpush1.bf16.msra.mxu0 %v3425_v36  ;;  %v3517_v36 = vld [vmem:[#allocation5 + $0x104] ss:$24 sps:$4 sm:$0xff]  }
  0xd0   :  { %2044 = vmatprep.subr.bf16.mxu0 %v3433_v37  ;;  %v3515_v37 = vld [vmem:[#allocation5 + $0x100] ss:$24 sps:$4 sm:$0xff]  }
  0xd1   :  { %2086 = vmatpush1.bf16.msra.mxu1 %v3428_v38  ;;  %v3520_v38 = vld [vmem:[#allocation5 + $0x404] ss:$24 sps:$4 sm:$0xff]  }
  0xd2   :  { %2087 = vmatprep.subr.bf16.mxu1 %v3436_v39  ;;  %v3518_v39 = vld [vmem:[#allocation5 + $0x400] ss:$24 sps:$4 sm:$0xff]  }
  0xd3   :  { %2045 = vmatpush1.bf16.msra.mxu0 %v3431_v40  ;;  %v3523_v40 = vld [vmem:[#allocation5 + $0xd4] ss:$24 sps:$4 sm:$0xff]  }
  0xd4   :  { %2046 = vmatprep.subr.bf16.mxu0 %v3439_v41  ;;  %v3521_v41 = vld [vmem:[#allocation5 + $0xd0] ss:$24 sps:$4 sm:$0xff]  }
  0xd5   :  { %2088 = vmatpush1.bf16.msra.mxu1 %v3434_v42  ;;  %v3526_v42 = vld [vmem:[#allocation5 + $0x3d4] ss:$24 sps:$4 sm:$0xff]  }
  0xd6   :  { %2089 = vmatprep.subr.bf16.mxu1 %v3442_v44  ;;  %v3529_v44 = vld [vmem:[#allocation5 + $0xa4] ss:$24 sps:$4 sm:$0xff]  }
  0xd7   :  { %2047 = vmatpush1.bf16.msra.mxu0 %v3437_v45  ;;  %v3527_v45 = vld [vmem:[#allocation5 + $0xa0] ss:$24 sps:$4 sm:$0xff]  }
  0xd8   :  { %2048 = vmatprep.subr.bf16.mxu0 %v3445_v46  ;;  %v3532_v46 = vld [vmem:[#allocation5 + $0x3a4] ss:$24 sps:$4 sm:$0xff]  }
  0xd9   :  { %2090 = vmatpush1.bf16.msra.mxu1 %v3440_v47  ;;  %v3535_v47 = vld [vmem:[#allocation5 + $0x74] ss:$24 sps:$4 sm:$0xff]  }
  0xda   :  { %2091 = vmatprep.subr.bf16.mxu1 %v3448_v48  ;;  %v3533_v48 = vld [vmem:[#allocation5 + $0x70] ss:$24 sps:$4 sm:$0xff]  }
  0xdb   :  { %2049 = vmatpush1.bf16.msra.mxu0 %v3443_v50  ;;  %v3538_v50 = vld [vmem:[#allocation5 + $0x374] ss:$24 sps:$4 sm:$0xff]  }
  0xdc   :  { %2050 = vmatprep.subr.bf16.mxu0 %v3451_v51  ;;  %v3536_v51 = vld [vmem:[#allocation5 + $0x370] ss:$24 sps:$4 sm:$0xff]  }
  0xdd   :  { %2092 = vmatpush1.bf16.msra.mxu1 %v3446_v52  ;;  %v3541_v52 = vld [vmem:[#allocation5 + $0x44] ss:$24 sps:$4 sm:$0xff]  }
  0xde   :  { %2093 = vmatprep.subr.bf16.mxu1 %v3454_v53  ;;  %v3544_v53 = vld [vmem:[#allocation5 + $0x344] ss:$24 sps:$4 sm:$0xff]  }
  0xdf   :  { %2051 = vmatpush1.bf16.msra.mxu0 %v3449_v54  ;;  %v3539_v54 = vld [vmem:[#allocation5 + $0x40] ss:$24 sps:$4 sm:$0xff]  }
  0xe0   :  { %2052 = vmatprep.subr.bf16.mxu0 %v3457_v56  ;;  %v3547_v56 = vld [vmem:[#allocation5 + $0x14] ss:$24 sps:$4 sm:$0xff]  }
  0xe1   :  { %2094 = vmatpush1.bf16.msra.mxu1 %v3452_v57  ;;  %v3542_v57 = vld [vmem:[#allocation5 + $0x340] ss:$24 sps:$4 sm:$0xff]  }
  0xe2   :  { %2095 = vmatprep.subr.bf16.mxu1 %v3460_v58  ;;  %v3550_v58 = vld [vmem:[#allocation5 + $0x314] ss:$24 sps:$4 sm:$0xff]  }
  0xe3   :  { %2053 = vmatpush2.bf16.msra.mxu0 %v3455_v59  ;;  %v3545_v59 = vld [vmem:[#allocation5 + $0x10] ss:$24 sps:$4 sm:$0xff]  }
  0xe4   :  { %2054 = vmatprep.subr.bf16.mxu0 %v3463_v60  ;;  %v3553_v60 = vld [vmem:[#allocation5 + $0x2e4] ss:$24 sps:$4 sm:$0xff]  }
  0xe5   :  { %2096 = vmatpush2.bf16.msra.mxu1 %v3458_v61  ;;  %v3548_v61 = vld [vmem:[#allocation5 + $0x310] ss:$24 sps:$4 sm:$0xff]  }
  0xe6   :  { %2097 = vmatprep.subr.bf16.mxu1 %v3466_v62  ;;  %v3551_v62 = vld [vmem:[#allocation5 + $0x2e0] ss:$24 sps:$4 sm:$0xff]  }
  0xe7   :  { %2055 = vmatpush2.bf16.msra.mxu0 %v3461_v63  ;;  %v3556_v63 = vld [vmem:[#allocation5 + $0x5e4] ss:$24 sps:$4 sm:$0xff]  }
  0xe8   :  { %2056 = vmatprep.subr.bf16.mxu0 %v3469_v0  ;;  %v3559_v0 = vld [vmem:[#allocation5 + $0x2b4] ss:$24 sps:$4 sm:$0xff]  }
  0xe9   :  { %2098 = vmatpush2.bf16.msra.mxu1 %v3464_v1  ;;  %v3554_v1 = vld [vmem:[#allocation5 + $0x5e0] ss:$24 sps:$4 sm:$0xff]  }
  0xea   :  { %2099 = vmatprep.subr.bf16.mxu1 %v3472_v2  ;;  %v3562_v2 = vld [vmem:[#allocation5 + $0x5b4] ss:$24 sps:$4 sm:$0xff]  }
  0xeb   :  { %2057 = vmatpush2.bf16.msra.mxu0 %v3467_v3  ;;  %v3557_v3 = vld [vmem:[#allocation5 + $0x2b0] ss:$24 sps:$4 sm:$0xff]  }
  0xec   :  { %2058 = vmatprep.subr.bf16.mxu0 %v3475_v4  ;;  %v3565_v4 = vld [vmem:[#allocation5 + $0x284] ss:$24 sps:$4 sm:$0xff]  }
  0xed   :  { %2100 = vmatpush2.bf16.msra.mxu1 %v3470_v5  ;;  %v3560_v5 = vld [vmem:[#allocation5 + $0x5b0] ss:$24 sps:$4 sm:$0xff]  }
  0xee   :  { %2101 = vmatprep.subr.bf16.mxu1 %v3478_v6  ;;  %v3568_v6 = vld [vmem:[#allocation5 + $0x584] ss:$24 sps:$4 sm:$0xff]  }
  0xef   :  { %2059 = vmatpush2.bf16.msra.mxu0 %v3473_v7  ;;  %v3563_v7 = vld [vmem:[#allocation5 + $0x280] ss:$24 sps:$4 sm:$0xff]  }
  0xf0   :  { %2060 = vmatprep.subr.bf16.mxu0 %v3481_v8  ;;  %v3571_v8 = vld [vmem:[#allocation5 + $0x254] ss:$24 sps:$4 sm:$0xff]  }
  0xf1   :  { %2102 = vmatpush2.bf16.msra.mxu1 %v3476_v9  ;;  %v3566_v9 = vld [vmem:[#allocation5 + $0x580] ss:$24 sps:$4 sm:$0xff]  }
  0xf2   :  { %2103 = vmatprep.subr.bf16.mxu1 %v3484_v10  ;;  %v3574_v10 = vld [vmem:[#allocation5 + $0x554] ss:$24 sps:$4 sm:$0xff]  }
  0xf3   :  { %2061 = vmatpush2.bf16.msra.mxu0 %v3479_v12  ;;  %v3569_v12 = vld [vmem:[#allocation5 + $0x250] ss:$24 sps:$4 sm:$0xff]  }
  0xf4   :  { %2062 = vmatprep.subr.bf16.mxu0 %v3487_v13  ;;  %v3577_v13 = vld [vmem:[#allocation5 + $0x224] ss:$24 sps:$4 sm:$0xff]  }
  0xf5   :  { %2104 = vmatpush2.bf16.msra.mxu1 %v3482_v15  ;;  %v3572_v15 = vld [vmem:[#allocation5 + $0x550] ss:$24 sps:$4 sm:$0xff]  }
  0xf6   :  { %2105 = vmatprep.subr.bf16.mxu1 %v3490_v16  ;;  %v3580_v16 = vld [vmem:[#allocation5 + $0x524] ss:$24 sps:$4 sm:$0xff]  }
  0xf7   :  { %2063 = vmatpush2.bf16.msra.mxu0 %v3485_v17  ;;  %v3575_v17 = vld [vmem:[#allocation5 + $0x220] ss:$24 sps:$4 sm:$0xff]  }
  0xf8   :  { %2064 = vmatprep.subr.bf16.mxu0 %v3493_v18  ;;  %v3583_v18 = vld [vmem:[#allocation5 + $0x1f4] ss:$24 sps:$4 sm:$0xff]  }
  0xf9   :  { %2106 = vmatpush2.bf16.msra.mxu1 %v3488_v19  ;;  %v3578_v19 = vld [vmem:[#allocation5 + $0x520] ss:$24 sps:$4 sm:$0xff]  }
  0xfa   :  { %2107 = vmatprep.subr.bf16.mxu1 %v3496_v20  ;;  %v3586_v20 = vld [vmem:[#allocation5 + $0x4f4] ss:$24 sps:$4 sm:$0xff]  }
  0xfb   :  { %2065 = vmatpush2.bf16.msra.mxu0 %v3491_v21  ;;  %v3581_v21 = vld [vmem:[#allocation5 + $0x1f0] ss:$24 sps:$4 sm:$0xff]  }
  0xfc   :  { %2066 = vmatprep.subr.bf16.mxu0 %v3499_v23  ;;  %v3589_v23 = vld [vmem:[#allocation5 + $0x1c4] ss:$24 sps:$4 sm:$0xff]  }
  0xfd   :  { %2108 = vmatpush2.bf16.msra.mxu1 %v3494_v24  ;;  %v3584_v24 = vld [vmem:[#allocation5 + $0x4f0] ss:$24 sps:$4 sm:$0xff]  }
  0xfe   :  { %2109 = vmatprep.subr.bf16.mxu1 %v3502_v25  ;;  %v3592_v25 = vld [vmem:[#allocation5 + $0x4c4] ss:$24 sps:$4 sm:$0xff]  }
  0xff   :  { %2067 = vmatpush2.bf16.msra.mxu0 %v3497_v26  ;;  %v3587_v26 = vld [vmem:[#allocation5 + $0x1c0] ss:$24 sps:$4 sm:$0xff]  }
 0x100   :  { %2122 = vmatprep.subr.bf16.mxu0 %v3505_v27  ;;  %v3595_v27 = vld [vmem:[#allocation5 + $0x194] ss:$24 sps:$4 sm:$0xff]  }
 0x101   :  { %2110 = vmatpush2.bf16.msra.mxu1 %v3500_v28  ;;  %v3590_v28 = vld [vmem:[#allocation5 + $0x4c0] ss:$24 sps:$4 sm:$0xff]  }
 0x102   :  { %2069 = vmatmul.mubr.bf16.vlgmr.msra.gmra.mxu0 %v3902_v14  ;;  %2165 = vmatprep.subr.bf16.mxu1 %v3508_v29  ;;  %v3598_v29 = vld [vmem:[#allocation5 + $0x494] ss:$24 sps:$4 sm:$0xff]  }
 0x103   :  { %2123 = vmatpush1.bf16.msra.mxu0 %v3503_v30  ;;  %2154 = vmatprep.mubr.bf16.mxu0 %v3894_v49  ;;  %v3524_v49 = vld [vmem:[#allocation5 + $0x3d0] ss:$24 sps:$4 sm:$0xff]  }
 0x104   :  { %2112 = vmatmul.mubr.bf16.vlgmr.msra.gmra.mxu1 %v3910_v22  ;;  %2124 = vmatprep.subr.bf16.mxu0 %v3511_v31  ;;  %v3593_v30 = vld [vmem:[#allocation5 + $0x190] ss:$24 sps:$4 sm:$0xff]   ;;  %v3601_v31 = vld [vmem:[#allocation5 + $0x764] ss:$24 sps:$4 sm:$0xff]  }
 0x105   :  { %2166 = vmatpush1.bf16.msra.mxu1 %v3506_v32  ;;  %2197 = vmatprep.mubr.bf16.mxu1 %v3897_v55  ;;  %v3530_v55 = vld [vmem:[#allocation5 + $0x3a0] ss:$24 sps:$4 sm:$0xff]   ;;  %v3596_v32 = vld [vmem:[#allocation5 + $0x490] ss:$24 sps:$4 sm:$0xff]  }
 0x106   :  { %2167 = vmatprep.subr.bf16.mxu1 %v3514_v34  ;;  %v3599_v34 = vld [vmem:[#allocation5 + $0x760] ss:$24 sps:$4 sm:$0xff]  }
 0x107   :  { %2125 = vmatpush1.bf16.msra.mxu0 %v3509_v33  ;;  %v3644_v33 = vld [vmem:[#allocation8 + $0x78] sm:$0xff]  }
 0x108   :  { %2126 = vmatprep.subr.bf16.mxu0 %v3517_v36  ;;  %v3648_v36 = vld [vmem:[#allocation8 + $0x38] sm:$0xff]  }
 0x109   :  { %2168 = vmatpush1.bf16.msra.mxu1 %v3512_v35  ;;  %v3604_v35 = vld [vmem:[#allocation5 + $0x734] ss:$24 sps:$4 sm:$0xff]  }
 0x10a   :  { %2169 = vmatprep.subr.bf16.mxu1 %v3520_v38  ;;  %v3602_v38 = vld [vmem:[#allocation5 + $0x730] ss:$24 sps:$4 sm:$0xff]  }
 0x10b   :  { %2127 = vmatpush1.bf16.msra.mxu0 %v3515_v37  ;;  %v3649_v37 = vld [vmem:[#allocation8 + $0x70] sm:$0xff]  }
 0x10c   :  { %2128 = vmatprep.subr.bf16.mxu0 %v3523_v40  ;;  %v3650_v40 = vld [vmem:[#allocation8 + $0x30] sm:$0xff]  }
 0x10d   :  { %2170 = vmatpush1.bf16.msra.mxu1 %v3518_v39  ;;  %v3607_v39 = vld [vmem:[#allocation5 + $0x704] ss:$24 sps:$4 sm:$0xff]  }
 0x10e   :  { %2171 = vmatprep.subr.bf16.mxu1 %v3526_v42  ;;  %v3605_v42 = vld [vmem:[#allocation5 + $0x700] ss:$24 sps:$4 sm:$0xff]  }
 0x10f   :  { %2129 = vmatpush1.bf16.msra.mxu0 %v3521_v41  ;;  %v3651_v41 = vld [vmem:[#allocation8 + $0x68] sm:$0xff]  }
 0x110   :  { %2130 = vmatprep.subr.bf16.mxu0 %v3529_v44  ;;  %v3653_v44 = vld [vmem:[#allocation8 + $0x60] sm:$0xff]  }
 0x111   :  { %2172 = vmatpush1.bf16.msra.mxu1 %v3524_v49  ;;  %v3610_v49 = vld [vmem:[#allocation5 + $0x6d4] ss:$24 sps:$4 sm:$0xff]  }
 0x112   :  { %2173 = vmatprep.subr.bf16.mxu1 %v3532_v46  ;;  %v3655_v46 = vld [vmem:[#allocation8 + $0x58] sm:$0xff]  }
 0x113   :  { %2131 = vmatpush1.bf16.msra.mxu0 %v3527_v45  ;;  %v3608_v45 = vld [vmem:[#allocation5 + $0x6d0] ss:$24 sps:$4 sm:$0xff]  }
 0x114   :  { %2132 = vmatprep.subr.bf16.mxu0 %v3535_v47  ;;  %v3616_v47 = vld [vmem:[#allocation5 + $0x674] ss:$24 sps:$4 sm:$0xff]  }
 0x115   :  { %2174 = vmatpush1.bf16.msra.mxu1 %v3530_v55  ;;  %v3611_v55 = vld [vmem:[#allocation5 + $0x6a0] ss:$24 sps:$4 sm:$0xff]  }
 0x116   :  { %2175 = vmatprep.subr.bf16.mxu1 %v3538_v50  ;;  %v3657_v50 = vld [vmem:[#allocation8 + $0x50] sm:$0xff]  }
 0x117   :  { %2133 = vmatpush1.bf16.msra.mxu0 %v3533_v48  ;;  %v3656_v48 = vld [vmem:[#allocation8 + $0x18] sm:$0xff]  }
 0x118   :  { %2134 = vmatprep.subr.bf16.mxu0 %v3541_v52  ;;  %v3619_v52 = vld [vmem:[#allocation5 + $0x644] ss:$24 sps:$4 sm:$0xff]  }
 0x119   :  { %2176 = vmatpush1.bf16.msra.mxu1 %v3536_v51  ;;  %v3614_v51 = vld [vmem:[#allocation5 + $0x670] ss:$24 sps:$4 sm:$0xff]  }
 0x11a   :  { %2177 = vmatprep.subr.bf16.mxu1 %v3544_v53  ;;  %v3658_v53 = vld [vmem:[#allocation8 + $0x10] sm:$0xff]  }
 0x11b   :  { %2135 = vmatpush1.bf16.msra.mxu0 %v3539_v54  ;;  %v3659_v54 = vld [vmem:[#allocation8 + $0x48] sm:$0xff]  }
 0x11c   :  { %2136 = vmatprep.subr.bf16.mxu0 %v3547_v56  ;;  %v3617_v56 = vld [vmem:[#allocation5 + $0x640] ss:$24 sps:$4 sm:$0xff]  }
 0x11d   :  { %2178 = vmatpush1.bf16.msra.mxu1 %v3542_v57  ;;  %v3622_v57 = vld [vmem:[#allocation5 + $0x614] ss:$24 sps:$4 sm:$0xff]  }
 0x11e   :  { %2179 = vmatprep.subr.bf16.mxu1 %v3550_v58  ;;  %v3660_v58 = vld [vmem:[#allocation8 + $0x8] sm:$0xff]  }
 0x11f   :  { %2137 = vmatpush1.bf16.msra.mxu0 %v3545_v59  ;;  %v3661_v59 = vld [vmem:[#allocation8 + $0x40] sm:$0xff]  }
 0x120   :  { %2138 = vmatprep.subr.bf16.mxu0 %v3553_v60  ;;  %v3620_v60 = vld [vmem:[#allocation5 + $0x610] ss:$24 sps:$4 sm:$0xff]  }
 0x121   :  { %2180 = vmatpush1.bf16.msra.mxu1 %v3548_v61  ;;  %v3625_v61 = vld [vmem:[#allocation5 + $0x8e4] ss:$24 sps:$4 sm:$0xff]  }
 0x122   :  { %2181 = vmatprep.subr.bf16.mxu1 %v3556_v63  ;;  %v3663_v63 = vld [vmem:[#allocation8 + $0xf8] sm:$0xff]  }
 0x123   :  { %2139 = vmatpush2.bf16.msra.mxu0 %v3551_v62  ;;  %v3662_v62 = vld [vmem:[#allocation8] sm:$0xff]  }
 0x124   :  { %2140 = vmatprep.subr.bf16.mxu0 %v3559_v0  ;;  %v3623_v0 = vld [vmem:[#allocation5 + $0x8e0] ss:$24 sps:$4 sm:$0xff]  }
 0x125   :  { %2182 = vmatpush2.bf16.msra.mxu1 %v3554_v1  ;;  %v3628_v1 = vld [vmem:[#allocation5 + $0x8b4] ss:$24 sps:$4 sm:$0xff]  }
 0x126   :  { %2183 = vmatprep.subr.bf16.mxu1 %v3562_v2  ;;  %v3626_v2 = vld [vmem:[#allocation5 + $0x8b0] ss:$24 sps:$4 sm:$0xff]  }
 0x127   :  { %2141 = vmatpush2.bf16.msra.mxu0 %v3557_v3  ;;  %v3631_v3 = vld [vmem:[#allocation5 + $0x884] ss:$24 sps:$4 sm:$0xff]  }
 0x128   :  { %2142 = vmatprep.subr.bf16.mxu0 %v3565_v4  ;;  %v3629_v4 = vld [vmem:[#allocation5 + $0x880] ss:$24 sps:$4 sm:$0xff]  }
 0x129   :  { %2184 = vmatpush2.bf16.msra.mxu1 %v3560_v5  ;;  %v3634_v5 = vld [vmem:[#allocation5 + $0x854] ss:$24 sps:$4 sm:$0xff]  }
 0x12a   :  { %2185 = vmatprep.subr.bf16.mxu1 %v3568_v6  ;;  %v3632_v6 = vld [vmem:[#allocation5 + $0x850] ss:$24 sps:$4 sm:$0xff]  }
 0x12b   :  { %2143 = vmatpush2.bf16.msra.mxu0 %v3563_v7  ;;  %v3637_v7 = vld [vmem:[#allocation5 + $0x824] ss:$24 sps:$4 sm:$0xff]  }
 0x12c   :  { %2144 = vmatprep.subr.bf16.mxu0 %v3571_v8  ;;  %v3635_v8 = vld [vmem:[#allocation5 + $0x820] ss:$24 sps:$4 sm:$0xff]  }
 0x12d   :  { %2186 = vmatpush2.bf16.msra.mxu1 %v3566_v9  ;;  %v3640_v9 = vld [vmem:[#allocation5 + $0x7f4] ss:$24 sps:$4 sm:$0xff]  }
 0x12e   :  { %2187 = vmatprep.subr.bf16.mxu1 %v3574_v10  ;;  %v394_v10 = vlaneseq }
 0x12f   :  { %2145 = vmatpush2.bf16.msra.mxu0 %v3569_v12  ;;  %v3638_v12 = vld [vmem:[#allocation5 + $0x7f0] ss:$24 sps:$4 sm:$0xff]  }
 0x130   :  { %2146 = vmatprep.subr.bf16.mxu0 %v3577_v13 }
 0x131   :  { %2188 = vmatpush2.bf16.msra.mxu1 %v3572_v15  ;;  %v3643_v15 = vld [vmem:[#allocation5 + $0x7c4] ss:$24 sps:$4 sm:$0xff]  }
 0x132   :  { %2189 = vmatprep.subr.bf16.mxu1 %v3580_v16  ;;  %v3923_v16 = vshrl.u32 %v394_v10, 7 }
 0x133   :  { %2147 = vmatpush2.bf16.msra.mxu0 %v3575_v17  ;;  %v3641_v17 = vld [vmem:[#allocation5 + $0x7c0] ss:$24 sps:$4 sm:$0xff]  }
 0x134   :  { %2148 = vmatprep.subr.bf16.mxu0 %v3583_v18 }
 0x135   :  { %2190 = vmatpush2.bf16.msra.mxu1 %v3578_v19 }
 0x136   :  { %2191 = vmatprep.subr.bf16.mxu1 %v3586_v20  ;;  %v3647_v20 = vld [vmem:[#allocation5 + $0x794] ss:$24 sps:$4 sm:$0xff]  }
 0x137   :  { %2149 = vmatpush2.bf16.msra.mxu0 %v3581_v21  ;;  %v396_v21 = vsub.s32 0, %v3923_v16 }
 0x138   :  { %2150 = vmatprep.subr.bf16.mxu0 %v3589_v23  ;;  %v3926_v23 = vld [vmem:[#allocation7] sm:$0x3f] }
 0x139   :  { %2192 = vmatpush2.bf16.msra.mxu1 %v3584_v24  ;;  %v400_v24 = vsub.s32 1, %v3923_v16 }
 0x13a   :  { %2193 = vmatprep.subr.bf16.mxu1 %v3592_v25  ;;  %v3645_v25 = vld [vmem:[#allocation5 + $0x790] ss:$24 sps:$4 sm:$0xff]  }
 0x13b   :  { %2151 = vmatpush2.bf16.msra.mxu0 %v3587_v26 }
 0x13c   :  { %2152 = vmatprep.subr.bf16.mxu0 %v3595_v27 }
 0x13d   :  { %2194 = vmatpush2.bf16.msra.mxu1 %v3590_v28  ;;  %v397_v28 = vrot.slane %v3926_v23, %v396_v21 }
 0x13e   :  { %2195 = vmatprep.subr.bf16.mxu1 %v3598_v29  ;;  %v401_v29 = vrot.slane %v3926_v23, %v400_v24  ;;  %v3684_v24 = vld [vmem:[#allocation8 + $0x128] sm:$0xff]  }
 0x13f   :  { %2153 = vmatpush2.bf16.msra.mxu0 %v3593_v30 }
 0x140   :  { %2208 = vmatprep.subr.bf16.mxu0 %v3601_v31 }
 0x141   :  { %2196 = vmatpush2.bf16.msra.mxu1 %v3596_v32 }
 0x142   :  { %2155 = vmatmul.mubr.bf16.vlgmr.msra.gmra.mxu0 %v3900_v11  ;;  %3135 = vmatprep.subr.bf16.mxu1 %v3644_v33  ;;  %v3652_v11 = vld [vmem:[#allocation8 + $0x28] sm:$0xff]   ;;  %v1898_v13 = vpop.f32.mrf.mxu0 }
 0x143   :  { %2209 = vmatpush1.bf16.msra.mxu0 %v3599_v34  ;;  %2240 = vmatprep.mubr.bf16.mxu0 %v3907_v43  ;;  %v3613_v43 = vld [vmem:[#allocation5 + $0x6a4] ss:$24 sps:$4 sm:$0xff]   ;;  %v1941_v19 = vpop.f32.mrf.mxu1  ;;  %v1899_v33 = vadd.f32 %v1898_v13, %v397_v28 }
 0x144   :  { %2198 = vmatmul.mubr.bf16.vlgmr.msra.gmra.mxu1 %v3902_v14  ;;  %2210 = vmatprep.subr.bf16.mxu0 %v3604_v35  ;;  %v3654_v14 = vld [vmem:[#allocation8 + $0x20] sm:$0xff]   ;;  %v1900_v18 = vpop.f32.mrf.mxu0  ;;  %v3682_v13 = vld [vmem:[#allocation8 + $0x130] sm:$0xff]  }
 0x145   :  { %3136 = vmatpush3.bf16.msra.mxu1 %v3648_v36  ;;  %v1943_v27 = vpop.f32.mrf.mxu1  ;;  %v1901_v35 = vadd.f32 %v1900_v18, %v401_v29 }
 0x146   :  { %3137 = vmatprep.subr.bf16.mxu1 %v3649_v37  ;;  %v1902_v26 = vpop.f32.mrf.mxu0 }
 0x147   :  { %2211 = vmatpush1.bf16.msra.mxu0 %v3602_v38  ;;  %v1945_v31 = vpop.f32.mrf.mxu1  ;;  %v1903_v32 = vadd.f32 %v1902_v26, %v397_v28 }
 0x148   :  { %2212 = vmatprep.subr.bf16.mxu0 %v3607_v39  ;;  %v1904_v30 = vpop.f32.mrf.mxu0 }
 0x149   :  { %3138 = vmatpush3.bf16.msra.mxu1 %v3650_v40  ;;  %v1905_v36 = vadd.f32 %v1904_v30, %v401_v29  ;;  %v1947_v37 = vpop.f32.mrf.mxu1  ;;  %v1946_v39 = vadd.f32 %v1945_v31, %v1903_v32  ;;  %v1942_v40 = vadd.f32 %v1941_v19, %v1899_v33  ;;  %v3683_v19 = vld [vmem:[#allocation8 + $0x168] sm:$0xff]   ;;  %v3685_v32 = vld [vmem:[#allocation8 + $0x160] sm:$0xff]  }
 0x14a   :  { %3139 = vmatprep.subr.bf16.mxu1 %v3651_v41 }
 0x14b   :  { %2213 = vmatpush1.bf16.msra.mxu0 %v3605_v42  ;;  %v1944_v42 = vadd.f32 %v1943_v27, %v1901_v35  ;;  %v3686_v35 = vld [vmem:[#allocation8 + $0x120] sm:$0xff]  }
 0x14c   :  { %2214 = vmatprep.subr.bf16.mxu0 %v3610_v49  ;;  %v1948_v49 = vadd.f32 %v1947_v37, %v1905_v36 }
 0x14d   :  { %3140 = vmatpush3.bf16.msra.mxu1 %v3652_v11 }
 0x14e   :  { %3141 = vmatprep.subr.bf16.mxu1 %v3653_v44 }
 0x14f   :  { %2215 = vmatpush1.bf16.msra.mxu0 %v3608_v45 }
 0x150   :  { %2216 = vmatprep.subr.bf16.mxu0 %v3613_v43 }
 0x151   :  { %3142 = vmatpush3.bf16.msra.mxu1 %v3654_v14 }
 0x152   :  { %3143 = vmatprep.subr.bf16.mxu1 %v3655_v46 }
 0x153   :  { %2217 = vmatpush1.bf16.msra.mxu0 %v3611_v55 }
 0x154   :  { %2218 = vmatprep.subr.bf16.mxu0 %v3616_v47  ;;  %v3679_v47 = vld [vmem:[#allocation8 + $0x178] sm:$0xff]  }
 0x155   :  { %3144 = vmatpush3.bf16.msra.mxu1 %v3656_v48  ;;  %v3680_v48 = vld [vmem:[#allocation8 + $0x138] sm:$0xff]  }
 0x156   :  { %3145 = vmatprep.subr.bf16.mxu1 %v3657_v50  ;;  %v3681_v50 = vld [vmem:[#allocation8 + $0x170] sm:$0xff]  }
 0x157   :  { %2219 = vmatpush1.bf16.msra.mxu0 %v3614_v51 }
 0x158   :  { %2220 = vmatprep.subr.bf16.mxu0 %v3619_v52  ;;  %v3665_v52 = vld [vmem:[#allocation8 + $0xf0] sm:$0xff]  }
 0x159   :  { %3146 = vmatpush3.bf16.msra.mxu1 %v3658_v53 }
 0x15a   :  { %3147 = vmatprep.subr.bf16.mxu1 %v3659_v54  ;;  %v3666_v54 = vld [vmem:[#allocation8 + $0xb0] sm:$0xff]  }
 0x15b   :  { %2221 = vmatpush1.bf16.msra.mxu0 %v3617_v56  ;;  %v3667_v56 = vld [vmem:[#allocation8 + $0xe8] sm:$0xff]  }
 0x15c   :  { %2222 = vmatprep.subr.bf16.mxu0 %v3622_v57  ;;  %v3668_v57 = vld [vmem:[#allocation8 + $0xa8] sm:$0xff]  }
 0x15d   :  { %3148 = vmatpush3.bf16.msra.mxu1 %v3660_v58  ;;  %v3669_v58 = vld [vmem:[#allocation8 + $0xe0] sm:$0xff]  }
 0x15e   :  { %3149 = vmatprep.subr.bf16.mxu1 %v3661_v59  ;;  %v3670_v59 = vld [vmem:[#allocation8 + $0xa0] sm:$0xff]  }
 0x15f   :  { %2223 = vmatpush1.bf16.msra.mxu0 %v3620_v60  ;;  %v3671_v60 = vld [vmem:[#allocation8 + $0xd8] sm:$0xff]  }
 0x160   :  { %2224 = vmatprep.subr.bf16.mxu0 %v3625_v61  ;;  %v3672_v61 = vld [vmem:[#allocation8 + $0x98] sm:$0xff]  }
 0x161   :  { %3150 = vmatpush3.bf16.msra.mxu1 %v3662_v62  ;;  %v3673_v62 = vld [vmem:[#allocation8 + $0xd0] sm:$0xff]  }
 0x162   :  { %3157 = vmatprep.subr.bf16.mxu1 %v3663_v63  ;;  %v3674_v63 = vld [vmem:[#allocation8 + $0x90] sm:$0xff]  }
 0x163   :  { %2225 = vmatpush2.bf16.msra.mxu0 %v3623_v0  ;;  %v3675_v0 = vld [vmem:[#allocation8 + $0xc8] sm:$0xff]  }
 0x164   :  { %2226 = vmatprep.subr.bf16.mxu0 %v3628_v1  ;;  %v3676_v1 = vld [vmem:[#allocation8 + $0x88] sm:$0xff]  }
 0x167   :  { %2227 = vmatpush2.bf16.msra.mxu0 %v3626_v2  ;;  %v3677_v2 = vld [vmem:[#allocation8 + $0xc0] sm:$0xff]  }
 0x168   :  { %2228 = vmatprep.subr.bf16.mxu0 %v3631_v3 }
 0x16b   :  { %2229 = vmatpush2.bf16.msra.mxu0 %v3629_v4  ;;  %v3678_v4 = vld [vmem:[#allocation8 + $0x80] sm:$0xff]  }
 0x16c   :  { %2230 = vmatprep.subr.bf16.mxu0 %v3634_v5 }
 0x16f   :  { %2231 = vmatpush2.bf16.msra.mxu0 %v3632_v6  ;;  %v404_v6 = vsub.s32 2, %v3923_v16 }
 0x170   :  { %2232 = vmatprep.subr.bf16.mxu0 %v3637_v7  ;;  %v408_v7 = vsub.s32 3, %v3923_v16 }
 0x172   :  { %v409_v10 = vrot.slane %v3926_v23, %v408_v7 }
 0x173   :  { %2233 = vmatpush2.bf16.msra.mxu0 %v3635_v8 }
 0x174   :  { %2234 = vmatprep.subr.bf16.mxu0 %v3640_v9  ;;  %v405_v9 = vrot.slane %v3926_v23, %v404_v6 }
 0x177   :  { %2235 = vmatpush2.bf16.msra.mxu0 %v3638_v12 }
 0x178   :  { %2236 = vmatprep.subr.bf16.mxu0 %v3643_v15 }
 0x17b   :  { %2237 = vmatpush2.bf16.msra.mxu0 %v3641_v17 }
 0x17c   :  { %2238 = vmatprep.subr.bf16.mxu0 %v3647_v20 }
 0x17f   :  { %2239 = vmatpush2.bf16.msra.mxu0 %v3645_v25 }
 0x180   :  { %3179 = vmatprep.subr.bf16.mxu0 %v3679_v47  ;;  %v3694_v47 = vld [vmem:[#allocation8 + $0x100] sm:$0xff]  }
 0x182   :  { %v1984_v34 = vpop.f32.mrf.mxu0  ;;  %2241 = vmatmul.mubr.bf16.vlgmr.msra.gmra.mxu0 %v3910_v22  ;;  %v3664_v22 = vld [vmem:[#allocation8 + $0xb8] sm:$0xff]  }
 0x183   :  { %v1985_v44 = vadd.f32 %v1984_v34, %v1942_v40  ;;  %3180 = vmatpush3.bf16.msra.mxu0 %v3680_v48 }
 0x184   :  { %v1986_v38 = vpop.f32.mrf.mxu0  ;;  %3181 = vmatprep.subr.bf16.mxu0 %v3681_v50  ;;  %v2027_v3 = vpop.f32.mrf.mxu1 }
 0x185   :  { %v1987_v43 = vadd.f32 %v1986_v38, %v1944_v42  ;;  %v2028_v15 = vadd.f32 %v2027_v3, %v405_v9  ;;  %v3687_v42 = vld [vmem:[#allocation8 + $0x158] sm:$0xff]  }
 0x186   :  { %v1988_v41 = vpop.f32.mrf.mxu0  ;;  %v2029_v5 = vpop.f32.mrf.mxu1 }
 0x187   :  { %v1989_v11 = vadd.f32 %v1988_v41, %v1946_v39  ;;  %3182 = vmatpush3.bf16.msra.mxu0 %v3682_v13  ;;  %v2030_v18 = vadd.f32 %v2029_v5, %v409_v10 }
 0x188   :  { %v1990_v45 = vpop.f32.mrf.mxu0  ;;  %v2031_v8 = vpop.f32.mrf.mxu1  ;;  %3183 = vmatprep.subr.bf16.mxu0 %v3683_v19 }
 0x189   :  { %v1991_v14 = vadd.f32 %v1990_v45, %v1948_v49  ;;  %v2251_v46 = vpack.c.bf16 %v1989_v11, %v1985_v44  ;;  %v2032_v25 = vadd.f32 %v2031_v8, %v405_v9  ;;  %v3688_v11 = vld [vmem:[#allocation8 + $0x118] sm:$0xff]   ;;  %v3689_v45 = vld [vmem:[#allocation8 + $0x150] sm:$0xff]  }
 0x18a   :  { %v2033_v12 = vpop.f32.mrf.mxu1 }
 0x18b   :  { %v2252_v55 = vpack.c.bf16 %v1991_v14, %v1987_v43  ;;  %3184 = vmatpush3.bf16.msra.mxu0 %v3684_v24  ;;  %v2034_v29 = vadd.f32 %v2033_v12, %v409_v10  ;;  %v3690_v43 = vld [vmem:[#allocation8 + $0x110] sm:$0xff]   ;;  %v3691_v14 = vld [vmem:[#allocation8 + $0x148] sm:$0xff]  }
 0x18c   :  { %3185 = vmatprep.subr.bf16.mxu0 %v3685_v32 }
 0x18d   :  { %3695 = vtanh.bf16 %v2252_v55  ;;  %v3693_v55 = vld [vmem:[#allocation8 + $0x140] sm:$0xff]  }
 0x18e   :  { %3697 = vtanh.bf16 %v2251_v46  ;;  %v3692_v46 = vld [vmem:[#allocation8 + $0x108] sm:$0xff]  }
 0x18f   :  { %3186 = vmatpush3.bf16.msra.mxu0 %v3686_v35 }
 0x190   :  { %3187 = vmatprep.subr.bf16.mxu0 %v3687_v42 }
 0x193   :  { %3188 = vmatpush3.bf16.msra.mxu0 %v3688_v11 }
 0x194   :  { %3189 = vmatprep.subr.bf16.mxu0 %v3689_v45 }
 0x197   :  { %3190 = vmatpush3.bf16.msra.mxu0 %v3690_v43 }
 0x198   :  { %3191 = vmatprep.subr.bf16.mxu0 %v3691_v14 }
 0x19b   :  { %v3696_v51 = vpop.eup %3695  ;;  %3192 = vmatpush3.bf16.msra.mxu0 %v3692_v46 }
 0x19c   :  { %v3698_v53 = vpop.eup %3697  ;;  %2686 = vmatprep.mubr.bf16.mxu1 %v3696_v51  ;;  %3193 = vmatprep.subr.bf16.mxu0 %v3693_v55 }
 0x19d   :  { %2687 = vmatmul.mubr.bf16.vlgmr.msra.gmra.mxu1 %v3698_v53  ;;  %v412_v53 = vsub.s32 4, %v3923_v16 }
 0x19e   :  { %3158 = vmatpush3.bf16.msra.mxu1 %v3664_v22 }
 0x19f   :  { %3159 = vmatprep.subr.bf16.mxu1 %v3665_v52  ;;  %3194 = vmatpush3.bf16.msra.mxu0 %v3694_v47 }
 0x1a2   :  { %3160 = vmatpush3.bf16.msra.mxu1 %v3666_v54  ;;  %v416_v54 = vsub.s32 5, %v3923_v16 }
 0x1a3   :  { %3161 = vmatprep.subr.bf16.mxu1 %v3667_v56 }
 0x1a6   :  { %3162 = vmatpush3.bf16.msra.mxu1 %v3668_v57 }
 0x1a7   :  { %3163 = vmatprep.subr.bf16.mxu1 %v3669_v58  ;;  %v413_v58 = vrot.slane %v3926_v23, %v412_v53 }
 0x1aa   :  { %3164 = vmatpush3.bf16.msra.mxu1 %v3670_v59  ;;  %v417_v59 = vrot.slane %v3926_v23, %v416_v54 }
 0x1ab   :  { %3165 = vmatprep.subr.bf16.mxu1 %v3671_v60 }
 0x1ae   :  { %3166 = vmatpush3.bf16.msra.mxu1 %v3672_v61 }
 0x1af   :  { %3167 = vmatprep.subr.bf16.mxu1 %v3673_v62 }
 0x1b2   :  { %3168 = vmatpush3.bf16.msra.mxu1 %v3674_v63 }
 0x1b3   :  { %3169 = vmatprep.subr.bf16.mxu1 %v3675_v0 }
 0x1b6   :  { %3170 = vmatpush3.bf16.msra.mxu1 %v3676_v1 }
 0x1b7   :  { %3171 = vmatprep.subr.bf16.mxu1 %v3677_v2 }
 0x1ba   :  { %3172 = vmatpush3.bf16.msra.mxu1 %v3678_v4 }
 0x1c2   :  { %v2070_v17 = vpop.f32.mrf.mxu0 }
 0x1c3   :  { %v2071_v26 = vadd.f32 %v2070_v17, %v2028_v15 }
 0x1c4   :  { %v2072_v20 = vpop.f32.mrf.mxu0  ;;  %v2113_v21 = vpop.f32.mrf.mxu1 }
 0x1c5   :  { %v2073_v30 = vadd.f32 %v2072_v20, %v2030_v18  ;;  %v2114_v38 = vadd.f32 %v2113_v21, %v2071_v26 }
 0x1c6   :  { %v2074_v27 = vpop.f32.mrf.mxu0  ;;  %v2115_v28 = vpop.f32.mrf.mxu1 }
 0x1c7   :  { %v2075_v31 = vadd.f32 %v2074_v27, %v2032_v25  ;;  %v2116_v40 = vadd.f32 %v2115_v28, %v2073_v30  ;;  %v3086_v30 = vld [vmem:[#allocation10] ss:$0 sm:$0xff] }
 0x1c8   :  { %v2076_v33 = vpop.f32.mrf.mxu0  ;;  %v2117_v34 = vpop.f32.mrf.mxu1 }
 0x1c9   :  { %v2077_v36 = vadd.f32 %v2076_v33, %v2034_v29  ;;  %v2118_v37 = vadd.f32 %v2117_v34, %v2075_v31 }
 0x1ca   :  { %v2119_v39 = vpop.f32.mrf.mxu1 }
 0x1cb   :  { %v2120_v41 = vadd.f32 %v2119_v39, %v2077_v36  ;;  %v2253_v49 = vpack.c.bf16 %v2118_v37, %v2114_v38 }
 0x1cd   :  { %v2254_v44 = vpack.c.bf16 %v2120_v41, %v2116_v40 }
 0x1cf   :  { %3699 = vtanh.bf16 %v2254_v44 }
 0x1d0   :  { %3701 = vtanh.bf16 %v2253_v49 }
 0x1dd   :  { %v3700_v48 = vpop.eup %3699 }
 0x1de   :  { %v3702_v50 = vpop.eup %3701  ;;  %2727 = vmatprep.mubr.bf16.mxu1 %v3700_v48 }
 0x1df   :  { %2728 = vmatmul.mubr.bf16.vlgmr.msra.gmra.mxu1 %v3702_v50 }
 0x202   :  { %v2156_v22 = vpop.f32.mrf.mxu0 }
 0x203   :  { %v2157_v63 = vadd.f32 %v2156_v22, %v413_v58 }
 0x204   :  { %v2158_v51 = vpop.f32.mrf.mxu0  ;;  %v2199_v52 = vpop.f32.mrf.mxu1 }
 0x205   :  { %v2159_v1 = vadd.f32 %v2158_v51, %v417_v59  ;;  %v2200_v6 = vadd.f32 %v2199_v52, %v2157_v63 }
 0x206   :  { %v2160_v56 = vpop.f32.mrf.mxu0  ;;  %v2201_v57 = vpop.f32.mrf.mxu1 }
 0x207   :  { %v2161_v62 = vadd.f32 %v2160_v56, %v413_v58  ;;  %v2202_v8 = vadd.f32 %v2201_v57, %v2159_v1 }
 0x208   :  { %v2162_v60 = vpop.f32.mrf.mxu0  ;;  %v2203_v61 = vpop.f32.mrf.mxu1 }
 0x209   :  { %v2163_v2 = vadd.f32 %v2162_v60, %v417_v59  ;;  %v2204_v5 = vadd.f32 %v2203_v61, %v2161_v62 }
 0x20a   :  { %v2205_v3 = vpop.f32.mrf.mxu1 }
 0x20b   :  { %v2206_v16 = vadd.f32 %v2205_v3, %v2163_v2 }
 0x242   :  { %v2242_v0 = vpop.f32.mrf.mxu0 }
 0x243   :  { %v2243_v10 = vadd.f32 %v2242_v0, %v2200_v6 }
 0x244   :  { %v2244_v4 = vpop.f32.mrf.mxu0 }
 0x245   :  { %v2245_v13 = vadd.f32 %v2244_v4, %v2202_v8 }
 0x246   :  { %v2246_v7 = vpop.f32.mrf.mxu0 }
 0x247   :  { %v2247_v9 = vadd.f32 %v2246_v7, %v2204_v5 }
 0x248   :  { %v2248_v12 = vpop.f32.mrf.mxu0 }
 0x249   :  { %v2249_v15 = vadd.f32 %v2248_v12, %v2206_v16  ;;  %v2255_v23 = vpack.c.bf16 %v2247_v9, %v2243_v10 }
 0x24b   :  { %v2256_v17 = vpack.c.bf16 %v2249_v15, %v2245_v13 }
 0x24d   :  { %3703 = vtanh.bf16 %v2256_v17 }
 0x24e   :  { %3705 = vtanh.bf16 %v2255_v23 }
 0x25b   :  { %v3704_v18 = vpop.eup %3703 }
 0x25c   :  { %v3706_v19 = vpop.eup %3705  ;;  %2768 = vmatprep.mubr.bf16.mxu0 %v3704_v18 }
 0x25d   :  { %2769 = vmatmul.mubr.bf16.vlgmr.msra.gmra.mxu0 %v3706_v19  ;;  %v3151_v20 = vpop.f32.mrf.mxu1 }
 0x25f   :  { %v3152_v21 = vpop.f32.mrf.mxu1 }
 0x260   :  { %v3153_v29 = vadd.f32 %v3152_v21, %v3151_v20 }
 0x261   :  { %v3154_v24 = vpop.f32.mrf.mxu1 }
 0x262   :  { %v2689_v34 = vadd.f32 %v3153_v29, %v3086_v30 }
 0x263   :  { %v3155_v25 = vpop.f32.mrf.mxu1 }
 0x264   :  { %v3156_v35 = vadd.f32 %v3155_v25, %v3154_v24 }
 0x266   :  { %v2692_v41 = vadd.f32 %v3156_v35, %v3086_v30 }
 0x29f   :  { %v3173_v26 = vpop.f32.mrf.mxu1 }
 0x2a1   :  { %v3174_v27 = vpop.f32.mrf.mxu1 }
 0x2a2   :  { %v3175_v31 = vadd.f32 %v3174_v27, %v3173_v26 }
 0x2a3   :  { %v3176_v28 = vpop.f32.mrf.mxu1 }
 0x2a4   :  { %v2730_v37 = vadd.f32 %v3175_v31, %v2689_v34 }
 0x2a5   :  { %v3177_v32 = vpop.f32.mrf.mxu1 }
 0x2a6   :  { %v3178_v38 = vadd.f32 %v3177_v32, %v3176_v28 }
 0x2a8   :  { %v2733_v11 = vadd.f32 %v3178_v38, %v2692_v41 }
 0x31d   :  { %v3195_v33 = vpop.f32.mrf.mxu0 }
 0x31f   :  { %v3196_v36 = vpop.f32.mrf.mxu0 }
 0x320   :  { %v3197_v39 = vadd.f32 %v3196_v36, %v3195_v33 }
 0x321   :  { %v3198_v40 = vpop.f32.mrf.mxu0 }
 0x322   :  { %v2771_v42 = vadd.f32 %v3197_v39, %v2730_v37 }
 0x323   :  { %v3199_v49 = vpop.f32.mrf.mxu0 }
 0x324   :  { %2777 = vst [vmem:[#allocation11] sm:$0xff] %v2771_v42  ;;  %v3200_v44 = vadd.f32 %v3199_v49, %v3198_v40 }
 0x326   :  { %v2774_v45 = vadd.f32 %v3200_v44, %v2733_v11 }
 0x328   :  { %2778 = vst [vmem:[#allocation11 + $0x8] sm:$0xff] %v2774_v45 }
 0x329   :  { %3818 = shalt.err (!%p3815_p1)
}
 0x32a   :  { %s3847_s23 = smov 128   ;;  %s3848_s24 = smov 8  }
 0x32b   :  { %2790 = dma.vmem_to_hbm [thread:$0]  %s2785_s4, 256, %s3948_s5, [#allocation4], %s3847_s23, %s3847_s23, %s3848_s24  }
 0x32c   :  { %3833 = dma.done.wait [#allocation4], 256  }
 0x32d   :  { %3834 = vsyncadd [#allocation4], 4294967040 }
 0x32e   :  { %2794 = vsyncpa [#allocation3], 1 }
 0x32f   :  { %2795 = vsyncpa [#allocation6], 1 }
 0x330   :  { %2796 = vsyncpa [#allocation9], 1 }
 0x331   :  { %2797 = vsyncpa [#allocation4], 1 }

</bundles_post_ra>
